<compile_context>
chip_gen: v6e
topology: v6e:2x2x1
jax: 0.10.0
libtpu: 0.0.40
codegen_flags: <defaults>
</compile_context>

<pallas_src>
import functools

import jax
import jax.numpy as jnp
import numpy as np
from jax.experimental import pallas as pl
from jax.experimental.pallas import tpu as pltpu


def _round_up(x, m):
    return ((x + m - 1) // m) * m


def _vmem_limit_bytes():
    """Per-generation VMEM budget: ~75% of physical (v7x 64MiB -> 48MiB,
    v5e/v6e 128MiB -> 96MiB). Conservative 48MiB fallback."""
    try:
        cap = getattr(pltpu.get_tpu_info(), "vmem_capacity_bytes", None)
        if cap:
            return int(min(96 * 1024 * 1024, cap * 3 // 4))
    except Exception:
        pass
    return 48 * 1024 * 1024


def _pad_gate_dim(a, H, H_pad):
    """Zero-pad the leading 4H gate axis to 4H_pad, padding EACH of the four
    (i, f, g, o) segments separately so the PyTorch gate order is preserved."""
    if H_pad == H:
        return a
    a4 = a.reshape((4, H) + a.shape[1:])
    pads = [(0, 0), (0, H_pad - H)] + [(0, 0)] * (a.ndim - 1)
    return jnp.pad(a4, pads).reshape((4 * H_pad,) + a.shape[1:])


# ---------------------------------------------------------------------------
# Recurrent kernel: t_block LSTM steps per grid iteration.
# grid = (batch_blocks [parallel], time_blocks [arbitrary/serial]).
# ---------------------------------------------------------------------------
def _lstm_recurrence_kernel(pg_ref, whh_hbm_ref, h_out_ref,
                            h_ref, c_ref, whh_vmem_ref, w_sem,
                            *, t_block, hidden):
    """pg_ref: (t_block, B_BLK, 4H) bf16 pre-gates; h_out_ref: (t_block, B_BLK, H) bf16."""

    @pl.when(pl.program_id(1) == 0)
    def _():
        # Fresh batch block: reset the carries and pull the loop-invariant
        # W_hh^T from HBM into a SINGLE (non-double-buffered) VMEM buffer.
        h_ref[...] = jnp.zeros_like(h_ref)
        c_ref[...] = jnp.zeros_like(c_ref)
        cp = pltpu.make_async_copy(whh_hbm_ref, whh_vmem_ref, w_sem)
        cp.start()
        cp.wait()

    h = h_ref[...]                       # (B_BLK, H) f32 carry
    c = c_ref[...]                       # (B_BLK, H) f32 carry
    whh_t = whh_vmem_ref[...]            # (H, 4H) bf16, loop-invariant
    H = hidden

    # Unrolled inner time loop: amortizes per-grid-step pipeline overhead and
    # DMA descriptor count. Gate slices are lane-aligned (H % 128 == 0).
    for i in range(t_block):
        gates = pg_ref[i].astype(jnp.float32) + jnp.dot(
            h.astype(jnp.bfloat16), whh_t, preferred_element_type=jnp.float32)
        i_g = jax.nn.sigmoid(gates[:, 0:H])          # PyTorch gate order i,f,g,o
        f_g = jax.nn.sigmoid(gates[:, H:2 * H])
        g_g = jnp.tanh(gates[:, 2 * H:3 * H])
        o_g = jax.nn.sigmoid(gates[:, 3 * H:4 * H])
        c = f_g * c + i_g * g_g
        h = o_g * jnp.tanh(c)
        h_out_ref[i] = h.astype(jnp.bfloat16)

    h_ref[...] = h
    c_ref[...] = c


# ---------------------------------------------------------------------------
# Hoisted output projection: tiled (M, H) @ (H, V) + b, fully parallel grid,
# bf16 operands / f32 accumulation.
# ---------------------------------------------------------------------------
def _fc_kernel(h_ref, w_ref, b_ref, o_ref):
    o_ref[...] = (jnp.dot(h_ref[...], w_ref[...],
                          preferred_element_type=jnp.float32)
                  + b_ref[...])


def _fc_pallas(h_bf16, w_t_bf16, b_f32, vmem_limit):
    """Lane-dense tiled matmul; vocab padded to a multiple of the tile width."""
    M, H = h_bf16.shape
    V = w_t_bf16.shape[1]

    tm = 512 if M >= 512 else (256 if M >= 256 else (128 if M >= 128 else _round_up(M, 8)))
    tn = 512 if V >= 512 else (256 if V >= 256 else 128)
    M_pad = _round_up(M, tm)
    V_pad = _round_up(V, tn)

    h_p = jnp.pad(h_bf16, ((0, M_pad - M), (0, 0)))
    w_p = jnp.pad(w_t_bf16, ((0, 0), (0, V_pad - V)))
    b_p = jnp.pad(b_f32, (0, V_pad - V)).reshape(1, V_pad)

    out = pl.pallas_call(
        _fc_kernel,
        out_shape=jax.ShapeDtypeStruct((M_pad, V_pad), jnp.float32),
        grid_spec=pltpu.PrefetchScalarGridSpec(
            num_scalar_prefetch=0,
            grid=(M_pad // tm, V_pad // tn),
            in_specs=[
                pl.BlockSpec((tm, H), lambda i, j: (i, 0)),
                pl.BlockSpec((H, tn), lambda i, j: (0, j)),
                pl.BlockSpec((1, tn), lambda i, j: (0, j)),
            ],
            out_specs=pl.BlockSpec((tm, tn), lambda i, j: (i, j)),
        ),
        compiler_params=pltpu.CompilerParams(
            dimension_semantics=("parallel", "parallel"),
            vmem_limit_bytes=vmem_limit),
    )(h_p, w_p, b_p)
    return out[:M, :V]


# ---------------------------------------------------------------------------
# Wrapper matching DecoderRNN.forward(features, captions, len) in eval mode.
# ---------------------------------------------------------------------------
def decoder_rnn_forward(params, features, captions, lengths=None, *, t_block=16):
    del lengths  # the PyTorch module never uses `len` either
    B, L = captions.shape
    H = params['w_hh'].shape[1]
    V = params['w_out'].shape[0]
    T = L + 1  # step 0 consumes the image features, steps 1..L the caption tokens

    # ---- alignment padding: H -> multiple of 128, B -> multiple of 8 ----
    # Per-gate zero padding guarantees padded hidden units stay exactly 0:
    # padded gate pre-activations are 0 => i=f=o=0.5, g=0 => c_pad=h_pad=0 forever.
    H_pad = _round_up(H, 128)
    B_pad = _round_up(B, 8)

    w_ih = _pad_gate_dim(params['w_ih'].astype(jnp.float32), H, H_pad)          # (4H_pad, E)
    w_hh = _pad_gate_dim(params['w_hh'].astype(jnp.float32), H, H_pad)          # (4H_pad, H)
    w_hh = jnp.pad(w_hh, ((0, 0), (0, H_pad - H)))                              # (4H_pad, H_pad)
    bias = _pad_gate_dim((params['b_ih'] + params['b_hh']).astype(jnp.float32), H, H_pad)
    w_out_t = jnp.pad(params['w_out'].astype(jnp.float32),
                      ((0, 0), (0, H_pad - H))).T                               # (H_pad, V)
    b_out = params['b_out'].astype(jnp.float32)

    feats = jnp.pad(features.astype(jnp.float32), ((0, B_pad - B), (0, 0)))     # (B_pad, E)
    caps = jnp.pad(captions, ((0, B_pad - B), (0, 0)))                          # (B_pad, L)

    # ---- glue: embedding gather + time-major step-input sequence ----
    emb = jnp.take(params['embed'].astype(jnp.float32), caps, axis=0)           # (B_pad, L, E)
    x_seq = jnp.concatenate([feats[:, None, :], emb], axis=1)                   # (B_pad, T, E)
    x_tm = jnp.transpose(x_seq, (1, 0, 2))                                      # (T, B_pad, E)

    # ---- hoisted input matmul: bf16 operands, f32 accumulate, bf16 storage ----
    pre_gates = jnp.einsum('tbe,ge->tbg',
                           x_tm.astype(jnp.bfloat16),
                           w_ih.astype(jnp.bfloat16),
                           preferred_element_type=jnp.float32) + bias[None, None, :]
    pre_gates = pre_gates.astype(jnp.bfloat16)                                  # (T, B_pad, 4H_pad)

    t_block = max(1, min(t_block, T))
    T_pad = _round_up(T, t_block)
    if T_pad != T:
        # Padded steps run on zero pre-gates *after* the real sequence; their
        # outputs are discarded and cannot affect earlier steps.
        pre_gates = jnp.pad(pre_gates, ((0, T_pad - T), (0, 0), (0, 0)))

    whh_t = w_hh.T.astype(jnp.bfloat16)                                         # (H_pad, 4H_pad)

    # Split the batch across the two v7x TensorCores when big enough
    # (each half keeps >= 8 sublanes); neutral on v5e/v6e.
    B_BLK = B_pad // 2 if (B_pad % 16 == 0) else B_pad
    vmem_limit = _vmem_limit_bytes()

    h_all = pl.pallas_call(
        functools.partial(_lstm_recurrence_kernel, t_block=t_block, hidden=H_pad),
        out_shape=jax.ShapeDtypeStruct((T_pad, B_pad, H_pad), jnp.bfloat16),
        grid_spec=pltpu.PrefetchScalarGridSpec(
            num_scalar_prefetch=0,
            grid=(B_pad // B_BLK, T_pad // t_block),
            in_specs=[
                pl.BlockSpec((t_block, B_BLK, 4 * H_pad), lambda b, i: (i, b, 0)),
                # W_hh^T stays in HBM; copied ONCE per batch block into a single
                # VMEM scratch buffer (no double-buffering of the invariant weight).
                pl.BlockSpec(memory_space=pl.ANY),
            ],
            out_specs=pl.BlockSpec((t_block, B_BLK, H_pad), lambda b, i: (i, b, 0)),
            scratch_shapes=[
                pltpu.VMEM((B_BLK, H_pad), jnp.float32),        # h carry (f32)
                pltpu.VMEM((B_BLK, H_pad), jnp.float32),        # c carry (f32)
                pltpu.VMEM((H_pad, 4 * H_pad), jnp.bfloat16),   # single-buffered W_hh^T
                pltpu.SemaphoreType.DMA(()),
            ]),
        compiler_params=pltpu.CompilerParams(
            dimension_semantics=("parallel", "arbitrary"),
            vmem_limit_bytes=vmem_limit),
    )(pre_gates, whh_t)

    # Steps 1..T-1 are the caption steps whose hidden states feed fc_out.
    h_caps = h_all[1:T, :B]                                                     # (L, B, H_pad) bf16
    h_flat = jnp.transpose(h_caps, (1, 0, 2)).reshape(B * L, H_pad)             # (B*L, H_pad)

    logits = _fc_pallas(h_flat, w_out_t.astype(jnp.bfloat16), b_out, vmem_limit)
    return logits.reshape(B, L, V)


# ---------------------------------------------------------------------------
# Pure-JAX f32 reference matching the PyTorch forward (eval mode).
# ---------------------------------------------------------------------------
def ref_forward(params, features, captions):
    B, L = captions.shape
    H = params['w_hh'].shape[1]

    def cell(x, h, c):
        gates = (x @ params['w_ih'].T + h @ params['w_hh'].T
                 + params['b_ih'] + params['b_hh'])
        i = jax.nn.sigmoid(gates[:, 0:H])
        f = jax.nn.sigmoid(gates[:, H:2 * H])
        g = jnp.tanh(gates[:, 2 * H:3 * H])
        o = jax.nn.sigmoid(gates[:, 3 * H:4 * H])
        c = f * c + i * g
        h = o * jnp.tanh(c)
        return h, c

    h = jnp.zeros((B, H), jnp.float32)
    c = jnp.zeros((B, H), jnp.float32)
    h, c = cell(features.astype(jnp.float32), h, c)
    emb = jnp.take(params['embed'], captions, axis=0)
    outs = []
    for t in range(L):
        h, c = cell(emb[:, t].astype(jnp.float32), h, c)
        outs.append(h @ params['w_out'].T + params['b_out'])
    return jnp.stack(outs, axis=1)


if __name__ == "__main__":
    # small shapes: batch=2, seq=8, embed=32, hidden=32, vocab=64
    B, L = 2, 8
    E, H, V = 32, 32, 64
    k = 1.0 / (H ** 0.5)

    key = jax.random.PRNGKey(0)
    keys = jax.random.split(key, 9)
    params = {
        'embed': jax.random.normal(keys[0], (V, E), jnp.float32) * 0.1,
        'w_ih': jax.random.uniform(keys[1], (4 * H, E), jnp.float32, -k, k),
        'w_hh': jax.random.uniform(keys[2], (4 * H, H), jnp.float32, -k, k),
        'b_ih': jax.random.uniform(keys[3], (4 * H,), jnp.float32, -k, k),
        'b_hh': jax.random.uniform(keys[4], (4 * H,), jnp.float32, -k, k),
        'w_out': jax.random.uniform(keys[5], (V, H), jnp.float32, -k, k),
        'b_out': jax.random.uniform(keys[6], (V,), jnp.float32, -k, k),
    }
    # features feed the LSTMCell directly, so they live in embed space: (B, E)
    features = jax.random.normal(keys[7], (B, E), jnp.float32)
    captions = jax.random.randint(keys[8], (B, L), 0, V, dtype=jnp.int32)

    out = decoder_rnn_forward(params, features, captions)
    out = jax.block_until_ready(out)

    ref = ref_forward(params, features, captions)
    assert out.shape == ref.shape == (B, L, V), (out.shape, ref.shape)
    # bf16 MXU operands (f32 accumulation) => looser tolerance vs the f32 reference.
    np.testing.assert_allclose(np.asarray(out), np.asarray(ref),
                               rtol=5e-2, atol=5e-2)
    print("KERNEL_OK")
</pallas_src>

<mosaic_0001>
module attributes {stable_mosaic.version = 11 : i64} {
  func.func @_lstm_recurrence_kernel(%arg0: i32, %arg1: i32, %arg2: memref<9x8x512xbf16, #tpu.memory_space<vmem>>, %arg3: memref<128x512xbf16, #tpu.memory_space<any>>, %arg4: memref<9x8x128xbf16, #tpu.memory_space<vmem>>, %arg5: memref<8x128xf32, #tpu.memory_space<vmem>>, %arg6: memref<8x128xf32, #tpu.memory_space<vmem>>, %arg7: memref<128x512xbf16, #tpu.memory_space<vmem>>, %arg8: memref<!tpu.dma_semaphore, #tpu.memory_space<semaphore_mem>>) attributes {dimension_semantics = [#tpu.dimension_semantics<parallel>, #tpu.dimension_semantics<arbitrary>], iteration_bounds = array<i64: 1, 1>, scalar_prefetch = 0 : i64, scratch_operands = 4 : i64, tpu.core_type = #tpu.core_type<tc>, window_params = [{transform_indices = @transform_0, window_bounds = array<i64: 9, 8, 512>}, {}, {transform_indices = @transform_2, window_bounds = array<i64: 9, 8, 128>}]} {
    %c0_i32 = arith.constant 0 : i32
    %0 = arith.cmpi eq, %arg1, %c0_i32 : i32
    %1 = arith.extui %0 : i1 to i32
    %c0_i32_0 = arith.constant 0 : i32
    %2 = arith.cmpi ne, %1, %c0_i32_0 : i32
    scf.if %2 {
      %cst_91 = arith.constant 0.000000e+00 : f32
      %323 = vector.broadcast %cst_91 : f32 to vector<8x128xf32>
      %c0_92 = arith.constant 0 : index
      %c0_93 = arith.constant 0 : index
      %324 = vector.load %arg5[%c0_92, %c0_93] : memref<8x128xf32, #tpu.memory_space<vmem>>, vector<8x128xf32>
      tpu.vector_store %arg5[%c0_92, %c0_93], %323 {strides = array<i32>} : memref<8x128xf32, #tpu.memory_space<vmem>>, vector<8x128xf32>,
      %cst_94 = arith.constant 0.000000e+00 : f32
      %325 = vector.broadcast %cst_94 : f32 to vector<8x128xf32>
      %c0_95 = arith.constant 0 : index
      %c0_96 = arith.constant 0 : index
      %326 = vector.load %arg6[%c0_95, %c0_96] : memref<8x128xf32, #tpu.memory_space<vmem>>, vector<8x128xf32>
      tpu.vector_store %arg6[%c0_95, %c0_96], %325 {strides = array<i32>} : memref<8x128xf32, #tpu.memory_space<vmem>>, vector<8x128xf32>,
      tpu.enqueue_dma source(%arg3 : memref<128x512xbf16, #tpu.memory_space<any>>) target(%arg7 : memref<128x512xbf16, #tpu.memory_space<vmem>>) target_semaphore(%arg8 : memref<!tpu.dma_semaphore, #tpu.memory_space<semaphore_mem>>)
      tpu.wait_dma2 semaphore(%arg8 : memref<!tpu.dma_semaphore, #tpu.memory_space<semaphore_mem>>) src(%arg3 : memref<128x512xbf16, #tpu.memory_space<any>>) dst(%arg7 : memref<128x512xbf16, #tpu.memory_space<vmem>>)
    } else {
    }
    %c0 = arith.constant 0 : index
    %c0_1 = arith.constant 0 : index
    %3 = vector.load %arg5[%c0, %c0_1] : memref<8x128xf32, #tpu.memory_space<vmem>>, vector<8x128xf32>
    %c0_2 = arith.constant 0 : index
    %c0_3 = arith.constant 0 : index
    %4 = vector.load %arg6[%c0_2, %c0_3] : memref<8x128xf32, #tpu.memory_space<vmem>>, vector<8x128xf32>
    %c0_4 = arith.constant 0 : index
    %c0_5 = arith.constant 0 : index
    %5 = vector.load %arg7[%c0_4, %c0_5] : memref<128x512xbf16, #tpu.memory_space<vmem>>, vector<128x512xbf16>
    %c0_6 = arith.constant 0 : index
    %c0_7 = arith.constant 0 : index
    %c0_8 = arith.constant 0 : index
    %6 = vector.load %arg2[%c0_6, %c0_7, %c0_8] : memref<9x8x512xbf16, #tpu.memory_space<vmem>>, vector<1x8x512xbf16>
    %7 = vector.shape_cast %6 : vector<1x8x512xbf16> to vector<8x512xbf16>
    %8 = arith.extf %7 : vector<8x512xbf16> to vector<8x512xf32>
    %9 = arith.truncf %3 : vector<8x128xf32> to vector<8x128xbf16>
    %cst = arith.constant dense<0.000000e+00> : vector<8x512xf32>
    %10 = tpu.matmul %9, %5, %cst {dimension_numbers = #tpu.dot_dimension_numbers<[1], [0], [0], [1], [0, 0, 1, 1], [], []>} : vector<8x128xbf16>, vector<128x512xbf16>, vector<8x512xf32> -> vector<8x512xf32>
    %11 = arith.addf %8, %10 : vector<8x512xf32>
    %12 = vector.extract_strided_slice %11 {offsets = [0, 0], sizes = [8, 128], strides = [1, 1]} : vector<8x512xf32> to vector<8x128xf32>
    %13 = arith.negf %12 : vector<8x128xf32>
    %14 = math.exp %13 : vector<8x128xf32>
    %cst_9 = arith.constant 1.000000e+00 : f32
    %15 = vector.broadcast %cst_9 : f32 to vector<8x128xf32>
    %16 = arith.addf %15, %14 : vector<8x128xf32>
    %17 = arith.divf %15, %16 : vector<8x128xf32>
    %18 = vector.extract_strided_slice %11 {offsets = [0, 128], sizes = [8, 128], strides = [1, 1]} : vector<8x512xf32> to vector<8x128xf32>
    %19 = arith.negf %18 : vector<8x128xf32>
    %20 = math.exp %19 : vector<8x128xf32>
    %cst_10 = arith.constant 1.000000e+00 : f32
    %21 = vector.broadcast %cst_10 : f32 to vector<8x128xf32>
    %22 = arith.addf %21, %20 : vector<8x128xf32>
    %23 = arith.divf %21, %22 : vector<8x128xf32>
    %24 = vector.extract_strided_slice %11 {offsets = [0, 256], sizes = [8, 128], strides = [1, 1]} : vector<8x512xf32> to vector<8x128xf32>
    %25 = math.tanh %24 : vector<8x128xf32>
    %26 = vector.extract_strided_slice %11 {offsets = [0, 384], sizes = [8, 128], strides = [1, 1]} : vector<8x512xf32> to vector<8x128xf32>
    %27 = arith.negf %26 : vector<8x128xf32>
    %28 = math.exp %27 : vector<8x128xf32>
    %cst_11 = arith.constant 1.000000e+00 : f32
    %29 = vector.broadcast %cst_11 : f32 to vector<8x128xf32>
    %30 = arith.addf %29, %28 : vector<8x128xf32>
    %31 = arith.divf %29, %30 : vector<8x128xf32>
    %32 = arith.mulf %23, %4 : vector<8x128xf32>
    %33 = arith.mulf %17, %25 : vector<8x128xf32>
    %34 = arith.addf %32, %33 : vector<8x128xf32>
    %35 = math.tanh %34 : vector<8x128xf32>
    %36 = arith.mulf %31, %35 : vector<8x128xf32>
    %37 = arith.truncf %36 : vector<8x128xf32> to vector<8x128xbf16>
    %c0_12 = arith.constant 0 : index
    %c0_13 = arith.constant 0 : index
    %c0_14 = arith.constant 0 : index
    %38 = vector.load %arg4[%c0_12, %c0_13, %c0_14] : memref<9x8x128xbf16, #tpu.memory_space<vmem>>, vector<1x8x128xbf16>
    %39 = vector.shape_cast %38 : vector<1x8x128xbf16> to vector<8x128xbf16>
    %40 = vector.shape_cast %37 : vector<8x128xbf16> to vector<1x8x128xbf16>
    tpu.vector_store %arg4[%c0_12, %c0_13, %c0_14], %40 {strides = array<i32>} : memref<9x8x128xbf16, #tpu.memory_space<vmem>>, vector<1x8x128xbf16>,
    %c1 = arith.constant 1 : index
    %c0_15 = arith.constant 0 : index
    %c0_16 = arith.constant 0 : index
    %41 = vector.load %arg2[%c1, %c0_15, %c0_16] : memref<9x8x512xbf16, #tpu.memory_space<vmem>>, vector<1x8x512xbf16>
    %42 = vector.shape_cast %41 : vector<1x8x512xbf16> to vector<8x512xbf16>
    %43 = arith.extf %42 : vector<8x512xbf16> to vector<8x512xf32>
    %44 = arith.truncf %36 : vector<8x128xf32> to vector<8x128xbf16>
    %cst_17 = arith.constant dense<0.000000e+00> : vector<8x512xf32>
    %45 = tpu.matmul %44, %5, %cst_17 {dimension_numbers = #tpu.dot_dimension_numbers<[1], [0], [0], [1], [0, 0, 1, 1], [], []>} : vector<8x128xbf16>, vector<128x512xbf16>, vector<8x512xf32> -> vector<8x512xf32>
    %46 = arith.addf %43, %45 : vector<8x512xf32>
    %47 = vector.extract_strided_slice %46 {offsets = [0, 0], sizes = [8, 128], strides = [1, 1]} : vector<8x512xf32> to vector<8x128xf32>
    %48 = arith.negf %47 : vector<8x128xf32>
    %49 = math.exp %48 : vector<8x128xf32>
    %cst_18 = arith.constant 1.000000e+00 : f32
    %50 = vector.broadcast %cst_18 : f32 to vector<8x128xf32>
    %51 = arith.addf %50, %49 : vector<8x128xf32>
    %52 = arith.divf %50, %51 : vector<8x128xf32>
    %53 = vector.extract_strided_slice %46 {offsets = [0, 128], sizes = [8, 128], strides = [1, 1]} : vector<8x512xf32> to vector<8x128xf32>
    %54 = arith.negf %53 : vector<8x128xf32>
    %55 = math.exp %54 : vector<8x128xf32>
    %cst_19 = arith.constant 1.000000e+00 : f32
    %56 = vector.broadcast %cst_19 : f32 to vector<8x128xf32>
    %57 = arith.addf %56, %55 : vector<8x128xf32>
    %58 = arith.divf %56, %57 : vector<8x128xf32>
    %59 = vector.extract_strided_slice %46 {offsets = [0, 256], sizes = [8, 128], strides = [1, 1]} : vector<8x512xf32> to vector<8x128xf32>
    %60 = math.tanh %59 : vector<8x128xf32>
    %61 = vector.extract_strided_slice %46 {offsets = [0, 384], sizes = [8, 128], strides = [1, 1]} : vector<8x512xf32> to vector<8x128xf32>
    %62 = arith.negf %61 : vector<8x128xf32>
    %63 = math.exp %62 : vector<8x128xf32>
    %cst_20 = arith.constant 1.000000e+00 : f32
    %64 = vector.broadcast %cst_20 : f32 to vector<8x128xf32>
    %65 = arith.addf %64, %63 : vector<8x128xf32>
    %66 = arith.divf %64, %65 : vector<8x128xf32>
    %67 = arith.mulf %58, %34 : vector<8x128xf32>
    %68 = arith.mulf %52, %60 : vector<8x128xf32>
    %69 = arith.addf %67, %68 : vector<8x128xf32>
    %70 = math.tanh %69 : vector<8x128xf32>
    %71 = arith.mulf %66, %70 : vector<8x128xf32>
    %72 = arith.truncf %71 : vector<8x128xf32> to vector<8x128xbf16>
    %c1_21 = arith.constant 1 : index
    %c0_22 = arith.constant 0 : index
    %c0_23 = arith.constant 0 : index
    %73 = vector.load %arg4[%c1_21, %c0_22, %c0_23] : memref<9x8x128xbf16, #tpu.memory_space<vmem>>, vector<1x8x128xbf16>
    %74 = vector.shape_cast %73 : vector<1x8x128xbf16> to vector<8x128xbf16>
    %75 = vector.shape_cast %72 : vector<8x128xbf16> to vector<1x8x128xbf16>
    tpu.vector_store %arg4[%c1_21, %c0_22, %c0_23], %75 {strides = array<i32>} : memref<9x8x128xbf16, #tpu.memory_space<vmem>>, vector<1x8x128xbf16>,
    %c2 = arith.constant 2 : index
    %c0_24 = arith.constant 0 : index
    %c0_25 = arith.constant 0 : index
    %76 = vector.load %arg2[%c2, %c0_24, %c0_25] : memref<9x8x512xbf16, #tpu.memory_space<vmem>>, vector<1x8x512xbf16>
    %77 = vector.shape_cast %76 : vector<1x8x512xbf16> to vector<8x512xbf16>
    %78 = arith.extf %77 : vector<8x512xbf16> to vector<8x512xf32>
    %79 = arith.truncf %71 : vector<8x128xf32> to vector<8x128xbf16>
    %cst_26 = arith.constant dense<0.000000e+00> : vector<8x512xf32>
    %80 = tpu.matmul %79, %5, %cst_26 {dimension_numbers = #tpu.dot_dimension_numbers<[1], [0], [0], [1], [0, 0, 1, 1], [], []>} : vector<8x128xbf16>, vector<128x512xbf16>, vector<8x512xf32> -> vector<8x512xf32>
    %81 = arith.addf %78, %80 : vector<8x512xf32>
    %82 = vector.extract_strided_slice %81 {offsets = [0, 0], sizes = [8, 128], strides = [1, 1]} : vector<8x512xf32> to vector<8x128xf32>
    %83 = arith.negf %82 : vector<8x128xf32>
    %84 = math.exp %83 : vector<8x128xf32>
    %cst_27 = arith.constant 1.000000e+00 : f32
    %85 = vector.broadcast %cst_27 : f32 to vector<8x128xf32>
    %86 = arith.addf %85, %84 : vector<8x128xf32>
    %87 = arith.divf %85, %86 : vector<8x128xf32>
    %88 = vector.extract_strided_slice %81 {offsets = [0, 128], sizes = [8, 128], strides = [1, 1]} : vector<8x512xf32> to vector<8x128xf32>
    %89 = arith.negf %88 : vector<8x128xf32>
    %90 = math.exp %89 : vector<8x128xf32>
    %cst_28 = arith.constant 1.000000e+00 : f32
    %91 = vector.broadcast %cst_28 : f32 to vector<8x128xf32>
    %92 = arith.addf %91, %90 : vector<8x128xf32>
    %93 = arith.divf %91, %92 : vector<8x128xf32>
    %94 = vector.extract_strided_slice %81 {offsets = [0, 256], sizes = [8, 128], strides = [1, 1]} : vector<8x512xf32> to vector<8x128xf32>
    %95 = math.tanh %94 : vector<8x128xf32>
    %96 = vector.extract_strided_slice %81 {offsets = [0, 384], sizes = [8, 128], strides = [1, 1]} : vector<8x512xf32> to vector<8x128xf32>
    %97 = arith.negf %96 : vector<8x128xf32>
    %98 = math.exp %97 : vector<8x128xf32>
    %cst_29 = arith.constant 1.000000e+00 : f32
    %99 = vector.broadcast %cst_29 : f32 to vector<8x128xf32>
    %100 = arith.addf %99, %98 : vector<8x128xf32>
    %101 = arith.divf %99, %100 : vector<8x128xf32>
    %102 = arith.mulf %93, %69 : vector<8x128xf32>
    %103 = arith.mulf %87, %95 : vector<8x128xf32>
    %104 = arith.addf %102, %103 : vector<8x128xf32>
    %105 = math.tanh %104 : vector<8x128xf32>
    %106 = arith.mulf %101, %105 : vector<8x128xf32>
    %107 = arith.truncf %106 : vector<8x128xf32> to vector<8x128xbf16>
    %c2_30 = arith.constant 2 : index
    %c0_31 = arith.constant 0 : index
    %c0_32 = arith.constant 0 : index
    %108 = vector.load %arg4[%c2_30, %c0_31, %c0_32] : memref<9x8x128xbf16, #tpu.memory_space<vmem>>, vector<1x8x128xbf16>
    %109 = vector.shape_cast %108 : vector<1x8x128xbf16> to vector<8x128xbf16>
    %110 = vector.shape_cast %107 : vector<8x128xbf16> to vector<1x8x128xbf16>
    tpu.vector_store %arg4[%c2_30, %c0_31, %c0_32], %110 {strides = array<i32>} : memref<9x8x128xbf16, #tpu.memory_space<vmem>>, vector<1x8x128xbf16>,
    %c3 = arith.constant 3 : index
    %c0_33 = arith.constant 0 : index
    %c0_34 = arith.constant 0 : index
    %111 = vector.load %arg2[%c3, %c0_33, %c0_34] : memref<9x8x512xbf16, #tpu.memory_space<vmem>>, vector<1x8x512xbf16>
    %112 = vector.shape_cast %111 : vector<1x8x512xbf16> to vector<8x512xbf16>
    %113 = arith.extf %112 : vector<8x512xbf16> to vector<8x512xf32>
    %114 = arith.truncf %106 : vector<8x128xf32> to vector<8x128xbf16>
    %cst_35 = arith.constant dense<0.000000e+00> : vector<8x512xf32>
    %115 = tpu.matmul %114, %5, %cst_35 {dimension_numbers = #tpu.dot_dimension_numbers<[1], [0], [0], [1], [0, 0, 1, 1], [], []>} : vector<8x128xbf16>, vector<128x512xbf16>, vector<8x512xf32> -> vector<8x512xf32>
    %116 = arith.addf %113, %115 : vector<8x512xf32>
    %117 = vector.extract_strided_slice %116 {offsets = [0, 0], sizes = [8, 128], strides = [1, 1]} : vector<8x512xf32> to vector<8x128xf32>
    %118 = arith.negf %117 : vector<8x128xf32>
    %119 = math.exp %118 : vector<8x128xf32>
    %cst_36 = arith.constant 1.000000e+00 : f32
    %120 = vector.broadcast %cst_36 : f32 to vector<8x128xf32>
    %121 = arith.addf %120, %119 : vector<8x128xf32>
    %122 = arith.divf %120, %121 : vector<8x128xf32>
    %123 = vector.extract_strided_slice %116 {offsets = [0, 128], sizes = [8, 128], strides = [1, 1]} : vector<8x512xf32> to vector<8x128xf32>
    %124 = arith.negf %123 : vector<8x128xf32>
    %125 = math.exp %124 : vector<8x128xf32>
    %cst_37 = arith.constant 1.000000e+00 : f32
    %126 = vector.broadcast %cst_37 : f32 to vector<8x128xf32>
    %127 = arith.addf %126, %125 : vector<8x128xf32>
    %128 = arith.divf %126, %127 : vector<8x128xf32>
    %129 = vector.extract_strided_slice %116 {offsets = [0, 256], sizes = [8, 128], strides = [1, 1]} : vector<8x512xf32> to vector<8x128xf32>
    %130 = math.tanh %129 : vector<8x128xf32>
    %131 = vector.extract_strided_slice %116 {offsets = [0, 384], sizes = [8, 128], strides = [1, 1]} : vector<8x512xf32> to vector<8x128xf32>
    %132 = arith.negf %131 : vector<8x128xf32>
    %133 = math.exp %132 : vector<8x128xf32>
    %cst_38 = arith.constant 1.000000e+00 : f32
    %134 = vector.broadcast %cst_38 : f32 to vector<8x128xf32>
    %135 = arith.addf %134, %133 : vector<8x128xf32>
    %136 = arith.divf %134, %135 : vector<8x128xf32>
    %137 = arith.mulf %128, %104 : vector<8x128xf32>
    %138 = arith.mulf %122, %130 : vector<8x128xf32>
    %139 = arith.addf %137, %138 : vector<8x128xf32>
    %140 = math.tanh %139 : vector<8x128xf32>
    %141 = arith.mulf %136, %140 : vector<8x128xf32>
    %142 = arith.truncf %141 : vector<8x128xf32> to vector<8x128xbf16>
    %c3_39 = arith.constant 3 : index
    %c0_40 = arith.constant 0 : index
    %c0_41 = arith.constant 0 : index
    %143 = vector.load %arg4[%c3_39, %c0_40, %c0_41] : memref<9x8x128xbf16, #tpu.memory_space<vmem>>, vector<1x8x128xbf16>
    %144 = vector.shape_cast %143 : vector<1x8x128xbf16> to vector<8x128xbf16>
    %145 = vector.shape_cast %142 : vector<8x128xbf16> to vector<1x8x128xbf16>
    tpu.vector_store %arg4[%c3_39, %c0_40, %c0_41], %145 {strides = array<i32>} : memref<9x8x128xbf16, #tpu.memory_space<vmem>>, vector<1x8x128xbf16>,
    %c4 = arith.constant 4 : index
    %c0_42 = arith.constant 0 : index
    %c0_43 = arith.constant 0 : index
    %146 = vector.load %arg2[%c4, %c0_42, %c0_43] : memref<9x8x512xbf16, #tpu.memory_space<vmem>>, vector<1x8x512xbf16>
    %147 = vector.shape_cast %146 : vector<1x8x512xbf16> to vector<8x512xbf16>
    %148 = arith.extf %147 : vector<8x512xbf16> to vector<8x512xf32>
    %149 = arith.truncf %141 : vector<8x128xf32> to vector<8x128xbf16>
    %cst_44 = arith.constant dense<0.000000e+00> : vector<8x512xf32>
    %150 = tpu.matmul %149, %5, %cst_44 {dimension_numbers = #tpu.dot_dimension_numbers<[1], [0], [0], [1], [0, 0, 1, 1], [], []>} : vector<8x128xbf16>, vector<128x512xbf16>, vector<8x512xf32> -> vector<8x512xf32>
    %151 = arith.addf %148, %150 : vector<8x512xf32>
    %152 = vector.extract_strided_slice %151 {offsets = [0, 0], sizes = [8, 128], strides = [1, 1]} : vector<8x512xf32> to vector<8x128xf32>
    %153 = arith.negf %152 : vector<8x128xf32>
    %154 = math.exp %153 : vector<8x128xf32>
    %cst_45 = arith.constant 1.000000e+00 : f32
    %155 = vector.broadcast %cst_45 : f32 to vector<8x128xf32>
    %156 = arith.addf %155, %154 : vector<8x128xf32>
    %157 = arith.divf %155, %156 : vector<8x128xf32>
    %158 = vector.extract_strided_slice %151 {offsets = [0, 128], sizes = [8, 128], strides = [1, 1]} : vector<8x512xf32> to vector<8x128xf32>
    %159 = arith.negf %158 : vector<8x128xf32>
    %160 = math.exp %159 : vector<8x128xf32>
    %cst_46 = arith.constant 1.000000e+00 : f32
    %161 = vector.broadcast %cst_46 : f32 to vector<8x128xf32>
    %162 = arith.addf %161, %160 : vector<8x128xf32>
    %163 = arith.divf %161, %162 : vector<8x128xf32>
    %164 = vector.extract_strided_slice %151 {offsets = [0, 256], sizes = [8, 128], strides = [1, 1]} : vector<8x512xf32> to vector<8x128xf32>
    %165 = math.tanh %164 : vector<8x128xf32>
    %166 = vector.extract_strided_slice %151 {offsets = [0, 384], sizes = [8, 128], strides = [1, 1]} : vector<8x512xf32> to vector<8x128xf32>
    %167 = arith.negf %166 : vector<8x128xf32>
    %168 = math.exp %167 : vector<8x128xf32>
    %cst_47 = arith.constant 1.000000e+00 : f32
    %169 = vector.broadcast %cst_47 : f32 to vector<8x128xf32>
    %170 = arith.addf %169, %168 : vector<8x128xf32>
    %171 = arith.divf %169, %170 : vector<8x128xf32>
    %172 = arith.mulf %163, %139 : vector<8x128xf32>
    %173 = arith.mulf %157, %165 : vector<8x128xf32>
    %174 = arith.addf %172, %173 : vector<8x128xf32>
    %175 = math.tanh %174 : vector<8x128xf32>
    %176 = arith.mulf %171, %175 : vector<8x128xf32>
    %177 = arith.truncf %176 : vector<8x128xf32> to vector<8x128xbf16>
    %c4_48 = arith.constant 4 : index
    %c0_49 = arith.constant 0 : index
    %c0_50 = arith.constant 0 : index
    %178 = vector.load %arg4[%c4_48, %c0_49, %c0_50] : memref<9x8x128xbf16, #tpu.memory_space<vmem>>, vector<1x8x128xbf16>
    %179 = vector.shape_cast %178 : vector<1x8x128xbf16> to vector<8x128xbf16>
    %180 = vector.shape_cast %177 : vector<8x128xbf16> to vector<1x8x128xbf16>
    tpu.vector_store %arg4[%c4_48, %c0_49, %c0_50], %180 {strides = array<i32>} : memref<9x8x128xbf16, #tpu.memory_space<vmem>>, vector<1x8x128xbf16>,
    %c5 = arith.constant 5 : index
    %c0_51 = arith.constant 0 : index
    %c0_52 = arith.constant 0 : index
    %181 = vector.load %arg2[%c5, %c0_51, %c0_52] : memref<9x8x512xbf16, #tpu.memory_space<vmem>>, vector<1x8x512xbf16>
    %182 = vector.shape_cast %181 : vector<1x8x512xbf16> to vector<8x512xbf16>
    %183 = arith.extf %182 : vector<8x512xbf16> to vector<8x512xf32>
    %184 = arith.truncf %176 : vector<8x128xf32> to vector<8x128xbf16>
    %cst_53 = arith.constant dense<0.000000e+00> : vector<8x512xf32>
    %185 = tpu.matmul %184, %5, %cst_53 {dimension_numbers = #tpu.dot_dimension_numbers<[1], [0], [0], [1], [0, 0, 1, 1], [], []>} : vector<8x128xbf16>, vector<128x512xbf16>, vector<8x512xf32> -> vector<8x512xf32>
    %186 = arith.addf %183, %185 : vector<8x512xf32>
    %187 = vector.extract_strided_slice %186 {offsets = [0, 0], sizes = [8, 128], strides = [1, 1]} : vector<8x512xf32> to vector<8x128xf32>
    %188 = arith.negf %187 : vector<8x128xf32>
    %189 = math.exp %188 : vector<8x128xf32>
    %cst_54 = arith.constant 1.000000e+00 : f32
    %190 = vector.broadcast %cst_54 : f32 to vector<8x128xf32>
    %191 = arith.addf %190, %189 : vector<8x128xf32>
    %192 = arith.divf %190, %191 : vector<8x128xf32>
    %193 = vector.extract_strided_slice %186 {offsets = [0, 128], sizes = [8, 128], strides = [1, 1]} : vector<8x512xf32> to vector<8x128xf32>
    %194 = arith.negf %193 : vector<8x128xf32>
    %195 = math.exp %194 : vector<8x128xf32>
    %cst_55 = arith.constant 1.000000e+00 : f32
    %196 = vector.broadcast %cst_55 : f32 to vector<8x128xf32>
    %197 = arith.addf %196, %195 : vector<8x128xf32>
    %198 = arith.divf %196, %197 : vector<8x128xf32>
    %199 = vector.extract_strided_slice %186 {offsets = [0, 256], sizes = [8, 128], strides = [1, 1]} : vector<8x512xf32> to vector<8x128xf32>
    %200 = math.tanh %199 : vector<8x128xf32>
    %201 = vector.extract_strided_slice %186 {offsets = [0, 384], sizes = [8, 128], strides = [1, 1]} : vector<8x512xf32> to vector<8x128xf32>
    %202 = arith.negf %201 : vector<8x128xf32>
    %203 = math.exp %202 : vector<8x128xf32>
    %cst_56 = arith.constant 1.000000e+00 : f32
    %204 = vector.broadcast %cst_56 : f32 to vector<8x128xf32>
    %205 = arith.addf %204, %203 : vector<8x128xf32>
    %206 = arith.divf %204, %205 : vector<8x128xf32>
    %207 = arith.mulf %198, %174 : vector<8x128xf32>
    %208 = arith.mulf %192, %200 : vector<8x128xf32>
    %209 = arith.addf %207, %208 : vector<8x128xf32>
    %210 = math.tanh %209 : vector<8x128xf32>
    %211 = arith.mulf %206, %210 : vector<8x128xf32>
    %212 = arith.truncf %211 : vector<8x128xf32> to vector<8x128xbf16>
    %c5_57 = arith.constant 5 : index
    %c0_58 = arith.constant 0 : index
    %c0_59 = arith.constant 0 : index
    %213 = vector.load %arg4[%c5_57, %c0_58, %c0_59] : memref<9x8x128xbf16, #tpu.memory_space<vmem>>, vector<1x8x128xbf16>
    %214 = vector.shape_cast %213 : vector<1x8x128xbf16> to vector<8x128xbf16>
    %215 = vector.shape_cast %212 : vector<8x128xbf16> to vector<1x8x128xbf16>
    tpu.vector_store %arg4[%c5_57, %c0_58, %c0_59], %215 {strides = array<i32>} : memref<9x8x128xbf16, #tpu.memory_space<vmem>>, vector<1x8x128xbf16>,
    %c6 = arith.constant 6 : index
    %c0_60 = arith.constant 0 : index
    %c0_61 = arith.constant 0 : index
    %216 = vector.load %arg2[%c6, %c0_60, %c0_61] : memref<9x8x512xbf16, #tpu.memory_space<vmem>>, vector<1x8x512xbf16>
    %217 = vector.shape_cast %216 : vector<1x8x512xbf16> to vector<8x512xbf16>
    %218 = arith.extf %217 : vector<8x512xbf16> to vector<8x512xf32>
    %219 = arith.truncf %211 : vector<8x128xf32> to vector<8x128xbf16>
    %cst_62 = arith.constant dense<0.000000e+00> : vector<8x512xf32>
    %220 = tpu.matmul %219, %5, %cst_62 {dimension_numbers = #tpu.dot_dimension_numbers<[1], [0], [0], [1], [0, 0, 1, 1], [], []>} : vector<8x128xbf16>, vector<128x512xbf16>, vector<8x512xf32> -> vector<8x512xf32>
    %221 = arith.addf %218, %220 : vector<8x512xf32>
    %222 = vector.extract_strided_slice %221 {offsets = [0, 0], sizes = [8, 128], strides = [1, 1]} : vector<8x512xf32> to vector<8x128xf32>
    %223 = arith.negf %222 : vector<8x128xf32>
    %224 = math.exp %223 : vector<8x128xf32>
    %cst_63 = arith.constant 1.000000e+00 : f32
    %225 = vector.broadcast %cst_63 : f32 to vector<8x128xf32>
    %226 = arith.addf %225, %224 : vector<8x128xf32>
    %227 = arith.divf %225, %226 : vector<8x128xf32>
    %228 = vector.extract_strided_slice %221 {offsets = [0, 128], sizes = [8, 128], strides = [1, 1]} : vector<8x512xf32> to vector<8x128xf32>
    %229 = arith.negf %228 : vector<8x128xf32>
    %230 = math.exp %229 : vector<8x128xf32>
    %cst_64 = arith.constant 1.000000e+00 : f32
    %231 = vector.broadcast %cst_64 : f32 to vector<8x128xf32>
    %232 = arith.addf %231, %230 : vector<8x128xf32>
    %233 = arith.divf %231, %232 : vector<8x128xf32>
    %234 = vector.extract_strided_slice %221 {offsets = [0, 256], sizes = [8, 128], strides = [1, 1]} : vector<8x512xf32> to vector<8x128xf32>
    %235 = math.tanh %234 : vector<8x128xf32>
    %236 = vector.extract_strided_slice %221 {offsets = [0, 384], sizes = [8, 128], strides = [1, 1]} : vector<8x512xf32> to vector<8x128xf32>
    %237 = arith.negf %236 : vector<8x128xf32>
    %238 = math.exp %237 : vector<8x128xf32>
    %cst_65 = arith.constant 1.000000e+00 : f32
    %239 = vector.broadcast %cst_65 : f32 to vector<8x128xf32>
    %240 = arith.addf %239, %238 : vector<8x128xf32>
    %241 = arith.divf %239, %240 : vector<8x128xf32>
    %242 = arith.mulf %233, %209 : vector<8x128xf32>
    %243 = arith.mulf %227, %235 : vector<8x128xf32>
    %244 = arith.addf %242, %243 : vector<8x128xf32>
    %245 = math.tanh %244 : vector<8x128xf32>
    %246 = arith.mulf %241, %245 : vector<8x128xf32>
    %247 = arith.truncf %246 : vector<8x128xf32> to vector<8x128xbf16>
    %c6_66 = arith.constant 6 : index
    %c0_67 = arith.constant 0 : index
    %c0_68 = arith.constant 0 : index
    %248 = vector.load %arg4[%c6_66, %c0_67, %c0_68] : memref<9x8x128xbf16, #tpu.memory_space<vmem>>, vector<1x8x128xbf16>
    %249 = vector.shape_cast %248 : vector<1x8x128xbf16> to vector<8x128xbf16>
    %250 = vector.shape_cast %247 : vector<8x128xbf16> to vector<1x8x128xbf16>
    tpu.vector_store %arg4[%c6_66, %c0_67, %c0_68], %250 {strides = array<i32>} : memref<9x8x128xbf16, #tpu.memory_space<vmem>>, vector<1x8x128xbf16>,
    %c7 = arith.constant 7 : index
    %c0_69 = arith.constant 0 : index
    %c0_70 = arith.constant 0 : index
    %251 = vector.load %arg2[%c7, %c0_69, %c0_70] : memref<9x8x512xbf16, #tpu.memory_space<vmem>>, vector<1x8x512xbf16>
    %252 = vector.shape_cast %251 : vector<1x8x512xbf16> to vector<8x512xbf16>
    %253 = arith.extf %252 : vector<8x512xbf16> to vector<8x512xf32>
    %254 = arith.truncf %246 : vector<8x128xf32> to vector<8x128xbf16>
    %cst_71 = arith.constant dense<0.000000e+00> : vector<8x512xf32>
    %255 = tpu.matmul %254, %5, %cst_71 {dimension_numbers = #tpu.dot_dimension_numbers<[1], [0], [0], [1], [0, 0, 1, 1], [], []>} : vector<8x128xbf16>, vector<128x512xbf16>, vector<8x512xf32> -> vector<8x512xf32>
    %256 = arith.addf %253, %255 : vector<8x512xf32>
    %257 = vector.extract_strided_slice %256 {offsets = [0, 0], sizes = [8, 128], strides = [1, 1]} : vector<8x512xf32> to vector<8x128xf32>
    %258 = arith.negf %257 : vector<8x128xf32>
    %259 = math.exp %258 : vector<8x128xf32>
    %cst_72 = arith.constant 1.000000e+00 : f32
    %260 = vector.broadcast %cst_72 : f32 to vector<8x128xf32>
    %261 = arith.addf %260, %259 : vector<8x128xf32>
    %262 = arith.divf %260, %261 : vector<8x128xf32>
    %263 = vector.extract_strided_slice %256 {offsets = [0, 128], sizes = [8, 128], strides = [1, 1]} : vector<8x512xf32> to vector<8x128xf32>
    %264 = arith.negf %263 : vector<8x128xf32>
    %265 = math.exp %264 : vector<8x128xf32>
    %cst_73 = arith.constant 1.000000e+00 : f32
    %266 = vector.broadcast %cst_73 : f32 to vector<8x128xf32>
    %267 = arith.addf %266, %265 : vector<8x128xf32>
    %268 = arith.divf %266, %267 : vector<8x128xf32>
    %269 = vector.extract_strided_slice %256 {offsets = [0, 256], sizes = [8, 128], strides = [1, 1]} : vector<8x512xf32> to vector<8x128xf32>
    %270 = math.tanh %269 : vector<8x128xf32>
    %271 = vector.extract_strided_slice %256 {offsets = [0, 384], sizes = [8, 128], strides = [1, 1]} : vector<8x512xf32> to vector<8x128xf32>
    %272 = arith.negf %271 : vector<8x128xf32>
    %273 = math.exp %272 : vector<8x128xf32>
    %cst_74 = arith.constant 1.000000e+00 : f32
    %274 = vector.broadcast %cst_74 : f32 to vector<8x128xf32>
    %275 = arith.addf %274, %273 : vector<8x128xf32>
    %276 = arith.divf %274, %275 : vector<8x128xf32>
    %277 = arith.mulf %268, %244 : vector<8x128xf32>
    %278 = arith.mulf %262, %270 : vector<8x128xf32>
    %279 = arith.addf %277, %278 : vector<8x128xf32>
    %280 = math.tanh %279 : vector<8x128xf32>
    %281 = arith.mulf %276, %280 : vector<8x128xf32>
    %282 = arith.truncf %281 : vector<8x128xf32> to vector<8x128xbf16>
    %c7_75 = arith.constant 7 : index
    %c0_76 = arith.constant 0 : index
    %c0_77 = arith.constant 0 : index
    %283 = vector.load %arg4[%c7_75, %c0_76, %c0_77] : memref<9x8x128xbf16, #tpu.memory_space<vmem>>, vector<1x8x128xbf16>
    %284 = vector.shape_cast %283 : vector<1x8x128xbf16> to vector<8x128xbf16>
    %285 = vector.shape_cast %282 : vector<8x128xbf16> to vector<1x8x128xbf16>
    tpu.vector_store %arg4[%c7_75, %c0_76, %c0_77], %285 {strides = array<i32>} : memref<9x8x128xbf16, #tpu.memory_space<vmem>>, vector<1x8x128xbf16>,
    %c8 = arith.constant 8 : index
    %c0_78 = arith.constant 0 : index
    %c0_79 = arith.constant 0 : index
    %286 = vector.load %arg2[%c8, %c0_78, %c0_79] : memref<9x8x512xbf16, #tpu.memory_space<vmem>>, vector<1x8x512xbf16>
    %287 = vector.shape_cast %286 : vector<1x8x512xbf16> to vector<8x512xbf16>
    %288 = arith.extf %287 : vector<8x512xbf16> to vector<8x512xf32>
    %289 = arith.truncf %281 : vector<8x128xf32> to vector<8x128xbf16>
    %cst_80 = arith.constant dense<0.000000e+00> : vector<8x512xf32>
    %290 = tpu.matmul %289, %5, %cst_80 {dimension_numbers = #tpu.dot_dimension_numbers<[1], [0], [0], [1], [0, 0, 1, 1], [], []>} : vector<8x128xbf16>, vector<128x512xbf16>, vector<8x512xf32> -> vector<8x512xf32>
    %291 = arith.addf %288, %290 : vector<8x512xf32>
    %292 = vector.extract_strided_slice %291 {offsets = [0, 0], sizes = [8, 128], strides = [1, 1]} : vector<8x512xf32> to vector<8x128xf32>
    %293 = arith.negf %292 : vector<8x128xf32>
    %294 = math.exp %293 : vector<8x128xf32>
    %cst_81 = arith.constant 1.000000e+00 : f32
    %295 = vector.broadcast %cst_81 : f32 to vector<8x128xf32>
    %296 = arith.addf %295, %294 : vector<8x128xf32>
    %297 = arith.divf %295, %296 : vector<8x128xf32>
    %298 = vector.extract_strided_slice %291 {offsets = [0, 128], sizes = [8, 128], strides = [1, 1]} : vector<8x512xf32> to vector<8x128xf32>
    %299 = arith.negf %298 : vector<8x128xf32>
    %300 = math.exp %299 : vector<8x128xf32>
    %cst_82 = arith.constant 1.000000e+00 : f32
    %301 = vector.broadcast %cst_82 : f32 to vector<8x128xf32>
    %302 = arith.addf %301, %300 : vector<8x128xf32>
    %303 = arith.divf %301, %302 : vector<8x128xf32>
    %304 = vector.extract_strided_slice %291 {offsets = [0, 256], sizes = [8, 128], strides = [1, 1]} : vector<8x512xf32> to vector<8x128xf32>
    %305 = math.tanh %304 : vector<8x128xf32>
    %306 = vector.extract_strided_slice %291 {offsets = [0, 384], sizes = [8, 128], strides = [1, 1]} : vector<8x512xf32> to vector<8x128xf32>
    %307 = arith.negf %306 : vector<8x128xf32>
    %308 = math.exp %307 : vector<8x128xf32>
    %cst_83 = arith.constant 1.000000e+00 : f32
    %309 = vector.broadcast %cst_83 : f32 to vector<8x128xf32>
    %310 = arith.addf %309, %308 : vector<8x128xf32>
    %311 = arith.divf %309, %310 : vector<8x128xf32>
    %312 = arith.mulf %303, %279 : vector<8x128xf32>
    %313 = arith.mulf %297, %305 : vector<8x128xf32>
    %314 = arith.addf %312, %313 : vector<8x128xf32>
    %315 = math.tanh %314 : vector<8x128xf32>
    %316 = arith.mulf %311, %315 : vector<8x128xf32>
    %317 = arith.truncf %316 : vector<8x128xf32> to vector<8x128xbf16>
    %c8_84 = arith.constant 8 : index
    %c0_85 = arith.constant 0 : index
    %c0_86 = arith.constant 0 : index
    %318 = vector.load %arg4[%c8_84, %c0_85, %c0_86] : memref<9x8x128xbf16, #tpu.memory_space<vmem>>, vector<1x8x128xbf16>
    %319 = vector.shape_cast %318 : vector<1x8x128xbf16> to vector<8x128xbf16>
    %320 = vector.shape_cast %317 : vector<8x128xbf16> to vector<1x8x128xbf16>
    tpu.vector_store %arg4[%c8_84, %c0_85, %c0_86], %320 {strides = array<i32>} : memref<9x8x128xbf16, #tpu.memory_space<vmem>>, vector<1x8x128xbf16>,
    %c0_87 = arith.constant 0 : index
    %c0_88 = arith.constant 0 : index
    %321 = vector.load %arg5[%c0_87, %c0_88] : memref<8x128xf32, #tpu.memory_space<vmem>>, vector<8x128xf32>
    tpu.vector_store %arg5[%c0_87, %c0_88], %316 {strides = array<i32>} : memref<8x128xf32, #tpu.memory_space<vmem>>, vector<8x128xf32>,
    %c0_89 = arith.constant 0 : index
    %c0_90 = arith.constant 0 : index
    %322 = vector.load %arg6[%c0_89, %c0_90] : memref<8x128xf32, #tpu.memory_space<vmem>>, vector<8x128xf32>
    tpu.vector_store %arg6[%c0_89, %c0_90], %314 {strides = array<i32>} : memref<8x128xf32, #tpu.memory_space<vmem>>, vector<8x128xf32>,
    return
  }
  func.func @transform_0(%arg0: i32, %arg1: i32) -> (i32, i32, i32) {
    %c0_i32 = arith.constant 0 : i32
    %c0_i32_0 = arith.constant 0 : i32
    return %arg1, %arg0, %c0_i32 : i32, i32, i32
  }
  func.func @transform_2(%arg0: i32, %arg1: i32) -> (i32, i32, i32) {
    %c0_i32 = arith.constant 0 : i32
    %c0_i32_0 = arith.constant 0 : i32
    return %arg1, %arg0, %c0_i32 : i32, i32, i32
  }
}

</mosaic_0001>

<bundles_post_ra>
// kernel: tpu_custom_call.1
= control target key start
LH: loop header
LB: loop body
LE: loop exit
PB: predicated region body
PF: predicated region fallthrough
CT: control target
= control target key end

     0   :  { %7 = vsyncpa [#allocation7], 0  ;;  %s2198_s0 = inlined_call_operand.hbm [shape: bf16[9,8,512], index: 0, kind: input, shape index: {}]   ;;  %s2199_s1 = inlined_call_operand.hbm [shape: bf16[128,512], index: 1, kind: input, shape index: {}]   ;;  %s2200_s2 = inlined_call_operand.hbm [shape: bf16[9,8,128], index: 2, kind: output, shape index: {}]  }
   0x1   :  { %8 = vsyncpa [#allocation8], 0  ;;  %s1703_s9 = smov [#allocation6]  }
   0x2   :  { %s14_s10 = sshll.u32 %s1703_s9, 4  ;;  %s15_s10 = int_to_ptr.vmem [resolvable:$true] %s14_s10 }
   0x3   :  { %s1645_s11 = scalar_lea.vmem %s15_s10, 2304  ;;  %p1650_p1 = scmp.lt.s32.totalorder %s15_s10, %s15_s10 }
   0x4   :  { %p1646_p0 = scmp.ne.s32.totalorder %s15_s10, %s1645_s11  ;;  %p1651_p2 = scmp.lt.s32.totalorder %s1645_s11, %s1645_s11 }
   0x6   :  { %p1652_p3 = por %p1651_p2, %p1650_p1 }
   0x8   :  { %p1653_p4 = pnand %p1652_p3, %p1646_p0 }
   0xa   :  { %1656 = shalt.err (!%p1653_p4)
}
   0xb   :  { %s1704_s12 = smov 256   ;;  %s1705_s13 = smov 16  }
   0xc   :  { %20 = dma.hbm_to_vmem [thread:$0]  %s2198_s0, 2304, %s15_s10, [#allocation7], %s1704_s12, %s1704_s12, %s1705_s13  }
   0xd   :  { %1697 = dma.done.wait [#allocation7], 2304  }
   0xe   :  { %1698 = vsyncadd [#allocation7], 4294964992  ;;  %s1706_s16 = smov [#allocation4]  }
   0xf   :  { %s38_s17 = sshll.u32 %s1706_s16, 4  ;;  %s39_s17 = int_to_ptr.vmem [resolvable:$true] %s38_s17 }
  0x10   :  { %s1665_s18 = scalar_lea.vmem %s39_s17, 4096  ;;  %p1670_p6 = scmp.lt.s32.totalorder %s39_s17, %s39_s17 }
  0x11   :  { %p1666_p5 = scmp.ne.s32.totalorder %s39_s17, %s1665_s18  ;;  %p1671_p7 = scmp.lt.s32.totalorder %s1665_s18, %s1665_s18 }
  0x13   :  { %p1672_p8 = por %p1671_p7, %p1670_p6 }
  0x15   :  { %p1673_p9 = pnand %p1672_p8, %p1666_p5 }
  0x17   :  { %1676 = shalt.err (!%p1673_p9)  }
  0x18   :  { %41 = dma.hbm_to_vmem [thread:$0]  %s2199_s1, 4096, %s39_s17, [#allocation5] }
  0x19   :  { %1699 = dma.done.wait [#allocation5], 4096 }
  0x1a   :  { %1700 = vsyncadd [#allocation5], 4294963200  ;;  %v1707_v0 = vmov 0   ;;  %v1735_v1 = vld [vmem:[#allocation4 + $0xe4] ss:$16 sps:$4 sm:$0xff]   ;;  %v1708_v33 = vmov 0.0|0.0  }
  0x1b   :  { %279 = vmatprep.mubr.bf16.mxu0 %v1707_v0  ;;  %320 = vmatprep.mubr.bf16.mxu1 %v1707_v0  ;;  %v1737_v2 = vld [vmem:[#allocation4 + $0xe0] ss:$16 sps:$4 sm:$0xff]   ;;  %v1740_v3 = vld [vmem:[#allocation4 + $0xc4] ss:$16 sps:$4 sm:$0xff]   ;;  %v1748_v6 = vld [vmem:[#allocation4 + $0xec] ss:$16 sps:$4 sm:$0xff]  }
  0x1c   :  { %247 = vmatprep.subr.bf16.mxu0 %v1735_v1  ;;  %v1743_v4 = vld [vmem:[#allocation4 + $0xc0] ss:$16 sps:$4 sm:$0xff]   ;;  %v1746_v5 = vld [vmem:[#allocation4 + $0xa4] ss:$16 sps:$4 sm:$0xff]   ;;  %v1750_v7 = vld [vmem:[#allocation4 + $0xe8] ss:$16 sps:$4 sm:$0xff]   ;;  %288 = vmatprep.subr.bf16.mxu1 %v1748_v6 }
  0x1d   :  { %248 = vmatpush1.bf16.msra.mxu0 %v1737_v2  ;;  %v1753_v8 = vld [vmem:[#allocation4 + $0xa0] ss:$16 sps:$4 sm:$0xff]   ;;  %v1757_v9 = vld [vmem:[#allocation4 + $0x84] ss:$16 sps:$4 sm:$0xff]   ;;  %289 = vmatpush1.bf16.msra.mxu1 %v1750_v7  ;;  %v1760_v10 = vld [vmem:[#allocation4 + $0xcc] ss:$16 sps:$4 sm:$0xff]  }
  0x1e   :  { %249 = vmatprep.subr.bf16.mxu0 %v1740_v3  ;;  %v1762_v11 = vld [vmem:[#allocation4 + $0xc8] ss:$16 sps:$4 sm:$0xff]   ;;  %290 = vmatprep.subr.bf16.mxu1 %v1760_v10  ;;  %v1766_v12 = vld [vmem:[#allocation4 + $0x80] ss:$16 sps:$4 sm:$0xff]   ;;  %v1768_v13 = vld [vmem:[#allocation4 + $0x64] ss:$16 sps:$4 sm:$0xff]  }
  0x1f   :  { %v1770_v14 = vld [vmem:[#allocation4 + $0xac] ss:$16 sps:$4 sm:$0xff]   ;;  %v1774_v15 = vld [vmem:[#allocation4 + $0xa8] ss:$16 sps:$4 sm:$0xff]   ;;  %v1780_v17 = vld [vmem:[#allocation4 + $0x60] ss:$16 sps:$4 sm:$0xff]  }
  0x20   :  { %v1777_v16 = vld [vmem:[#allocation4 + $0x8c] ss:$16 sps:$4 sm:$0xff]   ;;  %v1783_v18 = vld [vmem:[#allocation4 + $0x44] ss:$16 sps:$4 sm:$0xff]   ;;  %v1786_v19 = vld [vmem:[#allocation4 + $0x88] ss:$16 sps:$4 sm:$0xff]  }
  0x21   :  { %250 = vmatpush1.bf16.msra.mxu0 %v1743_v4  ;;  %291 = vmatpush1.bf16.msra.mxu1 %v1762_v11  ;;  %v1789_v20 = vld [vmem:[#allocation4 + $0x6c] ss:$16 sps:$4 sm:$0xff]   ;;  %v1792_v21 = vld [vmem:[#allocation4 + $0x40] ss:$16 sps:$4 sm:$0xff]   ;;  %v1794_v22 = vld [vmem:[#allocation4 + $0x24] ss:$16 sps:$4 sm:$0xff]  }
  0x22   :  { %251 = vmatprep.subr.bf16.mxu0 %v1746_v5  ;;  %292 = vmatprep.subr.bf16.mxu1 %v1770_v14  ;;  %v1798_v23 = vld [vmem:[#allocation4 + $0x68] ss:$16 sps:$4 sm:$0xff]   ;;  %v1801_v24 = vld [vmem:[#allocation4 + $0x4c] ss:$16 sps:$4 sm:$0xff]   ;;  %v1804_v25 = vld [vmem:[#allocation4 + $0x20] ss:$16 sps:$4 sm:$0xff]  }
  0x23   :  { %v1807_v26 = vld [vmem:[#allocation4 + $0x4] ss:$16 sps:$4 sm:$0xff]   ;;  %v1810_v27 = vld [vmem:[#allocation4 + $0x48] ss:$16 sps:$4 sm:$0xff]   ;;  %v1813_v28 = vld [vmem:[#allocation4 + $0x2c] ss:$16 sps:$4 sm:$0xff]  }
  0x24   :  { %v1816_v29 = vld [vmem:[#allocation4] ss:$16 sps:$4 sm:$0xff]   ;;  %v1820_v30 = vld [vmem:[#allocation4 + $0x28] ss:$16 sps:$4 sm:$0xff]   ;;  %v1823_v31 = vld [vmem:[#allocation4 + $0xc] ss:$16 sps:$4 sm:$0xff]  }
  0x25   :  { %252 = vmatpush1.bf16.msra.mxu0 %v1753_v8  ;;  %293 = vmatpush1.bf16.msra.mxu1 %v1774_v15  ;;  %v1827_v32 = vld [vmem:[#allocation4 + $0x8] ss:$16 sps:$4 sm:$0xff]   ;;  %v80_v34 = vld [vmem:[#allocation6] sm:$0xff]  ;;  %s1709_s0 = smov [#allocation9]  }
  0x26   :  { %253 = vmatprep.subr.bf16.mxu0 %v1757_v9  ;;  %294 = vmatprep.subr.bf16.mxu1 %v1777_v16  ;;  %v82_v35 = vunpack.c.l.bf16 %v80_v34  ;;  %v83_v36 = vunpack.c.h.bf16 %v80_v34  ;;  %v81_v44 = vld [vmem:[#allocation6 + $0x8] sm:$0xff]  ;;  %s1326_s1 = sshll.u32 %s1709_s0, 4  ;;  %s1327_s1 = int_to_ptr.vmem [resolvable:$true] %s1326_s1 }
  0x27   :  { %v85_v48 = vunpack.c.h.bf16 %v81_v44  ;;  %v84_v50 = vunpack.c.l.bf16 %v81_v44  ;;  %s1677_s21 = scalar_lea.vmem %s1327_s1, 576  ;;  %p1682_p11 = scmp.lt.s32.totalorder %s1327_s1, %s1327_s1 }
  0x28   :  { %p1678_p10 = scmp.ne.s32.totalorder %s1327_s1, %s1677_s21  ;;  %p1683_p12 = scmp.lt.s32.totalorder %s1677_s21, %s1677_s21 }
  0x29   :  { %254 = vmatpush1.bf16.msra.mxu0 %v1766_v12  ;;  %295 = vmatpush1.bf16.msra.mxu1 %v1786_v19 }
  0x2a   :  { %255 = vmatprep.subr.bf16.mxu0 %v1768_v13  ;;  %296 = vmatprep.subr.bf16.mxu1 %v1789_v20  ;;  %p1684_p13 = por %p1683_p12, %p1682_p11 }
  0x2c   :  { %p1685_p0 = pnand %p1684_p13, %p1678_p10 }
  0x2d   :  { %256 = vmatpush1.bf16.msra.mxu0 %v1780_v17  ;;  %297 = vmatpush1.bf16.msra.mxu1 %v1798_v23 }
  0x2e   :  { %257 = vmatprep.subr.bf16.mxu0 %v1783_v18  ;;  %298 = vmatprep.subr.bf16.mxu1 %v1801_v24 }
  0x31   :  { %258 = vmatpush1.bf16.msra.mxu0 %v1792_v21  ;;  %299 = vmatpush1.bf16.msra.mxu1 %v1810_v27 }
  0x32   :  { %259 = vmatprep.subr.bf16.mxu0 %v1794_v22  ;;  %300 = vmatprep.subr.bf16.mxu1 %v1813_v28 }
  0x35   :  { %260 = vmatpush1.bf16.msra.mxu0 %v1804_v25  ;;  %301 = vmatpush1.bf16.msra.mxu1 %v1820_v30 }
  0x36   :  { %261 = vmatprep.subr.bf16.mxu0 %v1807_v26  ;;  %302 = vmatprep.subr.bf16.mxu1 %v1823_v31 }
  0x39   :  { %262 = vmatpush1.bf16.msra.mxu0 %v1816_v29  ;;  %303 = vmatpush1.bf16.msra.mxu1 %v1827_v32 }
  0x3a   :  { %366 = vmatprep.subr.bf16.mxu0 %v1735_v1  ;;  %407 = vmatprep.subr.bf16.mxu1 %v1748_v6 }
  0x3c   :  { %280 = vmatmul.mubr.bf16.vlgmr.msra.gmra.mxu0 %v1708_v33  ;;  %321 = vmatmul.mubr.bf16.vlgmr.msra.gmra.mxu1 %v1708_v33 }
  0x3d   :  { %367 = vmatpush1.bf16.msra.mxu0 %v1737_v2  ;;  %398 = vmatprep.mubr.bf16.mxu0 %v1707_v0 }
  0x3e   :  { %368 = vmatprep.subr.bf16.mxu0 %v1740_v3  ;;  %408 = vmatpush1.bf16.msra.mxu1 %v1750_v7 }
  0x3f   :  { %409 = vmatprep.subr.bf16.mxu1 %v1760_v10  ;;  %439 = vmatprep.mubr.bf16.mxu1 %v1707_v0 }
  0x41   :  { %369 = vmatpush1.bf16.msra.mxu0 %v1743_v4 }
  0x42   :  { %370 = vmatprep.subr.bf16.mxu0 %v1746_v5  ;;  %410 = vmatpush1.bf16.msra.mxu1 %v1762_v11 }
  0x43   :  { %411 = vmatprep.subr.bf16.mxu1 %v1770_v14 }
  0x45   :  { %371 = vmatpush1.bf16.msra.mxu0 %v1753_v8 }
  0x46   :  { %372 = vmatprep.subr.bf16.mxu0 %v1757_v9  ;;  %412 = vmatpush1.bf16.msra.mxu1 %v1774_v15 }
  0x47   :  { %413 = vmatprep.subr.bf16.mxu1 %v1777_v16 }
  0x49   :  { %373 = vmatpush1.bf16.msra.mxu0 %v1766_v12 }
  0x4a   :  { %374 = vmatprep.subr.bf16.mxu0 %v1768_v13  ;;  %414 = vmatpush1.bf16.msra.mxu1 %v1786_v19 }
  0x4b   :  { %415 = vmatprep.subr.bf16.mxu1 %v1789_v20 }
  0x4d   :  { %375 = vmatpush1.bf16.msra.mxu0 %v1780_v17 }
  0x4e   :  { %376 = vmatprep.subr.bf16.mxu0 %v1783_v18  ;;  %416 = vmatpush1.bf16.msra.mxu1 %v1798_v23 }
  0x4f   :  { %417 = vmatprep.subr.bf16.mxu1 %v1801_v24 }
  0x51   :  { %377 = vmatpush1.bf16.msra.mxu0 %v1792_v21 }
  0x52   :  { %378 = vmatprep.subr.bf16.mxu0 %v1794_v22  ;;  %418 = vmatpush1.bf16.msra.mxu1 %v1810_v27 }
  0x53   :  { %419 = vmatprep.subr.bf16.mxu1 %v1813_v28 }
  0x55   :  { %379 = vmatpush1.bf16.msra.mxu0 %v1804_v25 }
  0x56   :  { %380 = vmatprep.subr.bf16.mxu0 %v1807_v26  ;;  %420 = vmatpush1.bf16.msra.mxu1 %v1820_v30 }
  0x57   :  { %421 = vmatprep.subr.bf16.mxu1 %v1823_v31 }
  0x59   :  { %381 = vmatpush1.bf16.msra.mxu0 %v1816_v29 }
  0x5a   :  { %486 = vmatprep.subr.bf16.mxu0 %v1735_v1  ;;  %422 = vmatpush1.bf16.msra.mxu1 %v1827_v32 }
  0x5b   :  { %527 = vmatprep.subr.bf16.mxu1 %v1748_v6 }
  0xfc   :  { %v281_v37 = vpop.f32.mrf.mxu0  ;;  %v322_v45 = vpop.f32.mrf.mxu1 }
  0xfd   :  { %v329_v38 = vadd.f32 %v281_v37, %v82_v35  ;;  %v331_v53 = vadd.f32 %v322_v45, %v84_v50 }
  0xfe   :  { %v283_v39 = vpop.f32.mrf.mxu0  ;;  %v324_v47 = vpop.f32.mrf.mxu1 }
  0xff   :  { %v1376_v40 = vmul.f32 -1.442695, %v329_v38  ;;  %v330_v41 = vadd.f32 %v283_v39, %v83_v36  ;;  %v332_v52 = vadd.f32 %v324_v47, %v85_v48 }
 0x100   :  { %v285_v42 = vpop.f32.mrf.mxu0  ;;  %v326_v49 = vpop.f32.mrf.mxu1 }
 0x101   :  { %1461 = vpow2.f32 %v1376_v40  ;;  %v1377_v43 = vmul.f32 -1.442695, %v330_v41  ;;  %v1378_v54 = vmul.f32 -1.442695, %v332_v52  ;;  %v360_v40 = vld [vmem:[#allocation6 + $0x10] sm:$0xff] }
 0x102   :  { %v286_v46 = vpop.f32.mrf.mxu0  ;;  %v327_v51 = vpop.f32.mrf.mxu1  ;;  %v362_v41 = vunpack.c.l.bf16 %v360_v40  ;;  %v363_v42 = vunpack.c.h.bf16 %v360_v40 }
 0x103   :  { %1463 = vpow2.f32 %v1377_v43 }
 0x104   :  { %1465 = vtanh.f32 %v331_v53 }
 0x105   :  { %1467 = vpow2.f32 %v1378_v54 }
 0x10e   :  { %v1462_v55 = vpop.eup %1461 }
 0x10f   :  { %v336_v56 = vadd.f32 1.0, %v1462_v55  ;;  %v361_v55 = vld [vmem:[#allocation6 + $0x18] sm:$0xff] }
 0x110   :  { %v1464_v57 = vpop.eup %1463 }
 0x111   :  { %1469 = vrcp.f32 %v336_v56  ;;  %v342_v58 = vadd.f32 1.0, %v1464_v57  ;;  %v1466_v59 = vpop.eup %1465  ;;  %v365_v56 = vunpack.c.h.bf16 %v361_v55 }
 0x112   :  { %v1468_v60 = vpop.eup %1467 }
 0x113   :  { %1471 = vrcp.f32 %v342_v58  ;;  %v349_v63 = vadd.f32 1.0, %v1468_v60  ;;  %v364_v58 = vunpack.c.l.bf16 %v361_v55 }
 0x115   :  { %1473 = vrcp.f32 %v349_v63 }
 0x11e   :  { %v1470_v61 = vpop.eup %1469 }
 0x11f   :  { %v353_v34 = vmul.f32 %v1470_v61, %v1466_v59 }
 0x120   :  { %v1472_v62 = vpop.eup %1471 }
 0x121   :  { %v352_v33 = vmul.f32 0.0, %v1472_v62 }
 0x122   :  { %v1474_v36 = vpop.eup %1473 }
 0x123   :  { %v1867_v35 = vadd.f32 %v353_v34, %v352_v33 }
 0x125   :  { %1475 = vtanh.f32 %v1867_v35 }
 0x132   :  { %v1476_v37 = vpop.eup %1475 }
 0x133   :  { %v356_v38 = vmul.f32 %v1476_v37, %v1474_v36 }
 0x135   :  { %v357_v39 = vpack.c.bf16 %v356_v38, %v356_v38 }
 0x137   :  { %358 = vst [vmem:[#allocation9] sm:$0xf] %v357_v39  ;;  %399 = vmatmul.mubr.bf16.vlgmr.msra.gmra.mxu0 %v357_v39  ;;  %440 = vmatmul.mubr.bf16.vlgmr.msra.gmra.mxu1 %v357_v39 }
 0x138   :  { %487 = vmatpush1.bf16.msra.mxu0 %v1737_v2  ;;  %528 = vmatpush1.bf16.msra.mxu1 %v1750_v7 }
 0x139   :  { %488 = vmatprep.subr.bf16.mxu0 %v1740_v3  ;;  %529 = vmatprep.subr.bf16.mxu1 %v1760_v10 }
 0x13a   :  { %518 = vmatprep.mubr.bf16.mxu0 %v1707_v0  ;;  %559 = vmatprep.mubr.bf16.mxu1 %v1707_v0 }
 0x13c   :  { %489 = vmatpush1.bf16.msra.mxu0 %v1743_v4  ;;  %530 = vmatpush1.bf16.msra.mxu1 %v1762_v11 }
 0x13d   :  { %490 = vmatprep.subr.bf16.mxu0 %v1746_v5  ;;  %531 = vmatprep.subr.bf16.mxu1 %v1770_v14 }
 0x140   :  { %491 = vmatpush1.bf16.msra.mxu0 %v1753_v8  ;;  %532 = vmatpush1.bf16.msra.mxu1 %v1774_v15 }
 0x141   :  { %492 = vmatprep.subr.bf16.mxu0 %v1757_v9  ;;  %533 = vmatprep.subr.bf16.mxu1 %v1777_v16 }
 0x144   :  { %493 = vmatpush1.bf16.msra.mxu0 %v1766_v12  ;;  %534 = vmatpush1.bf16.msra.mxu1 %v1786_v19 }
 0x145   :  { %494 = vmatprep.subr.bf16.mxu0 %v1768_v13  ;;  %535 = vmatprep.subr.bf16.mxu1 %v1789_v20 }
 0x148   :  { %495 = vmatpush1.bf16.msra.mxu0 %v1780_v17  ;;  %536 = vmatpush1.bf16.msra.mxu1 %v1798_v23 }
 0x149   :  { %496 = vmatprep.subr.bf16.mxu0 %v1783_v18  ;;  %537 = vmatprep.subr.bf16.mxu1 %v1801_v24 }
 0x14c   :  { %497 = vmatpush1.bf16.msra.mxu0 %v1792_v21  ;;  %538 = vmatpush1.bf16.msra.mxu1 %v1810_v27 }
 0x14d   :  { %498 = vmatprep.subr.bf16.mxu0 %v1794_v22  ;;  %539 = vmatprep.subr.bf16.mxu1 %v1813_v28 }
 0x150   :  { %499 = vmatpush1.bf16.msra.mxu0 %v1804_v25  ;;  %540 = vmatpush1.bf16.msra.mxu1 %v1820_v30 }
 0x151   :  { %500 = vmatprep.subr.bf16.mxu0 %v1807_v26  ;;  %541 = vmatprep.subr.bf16.mxu1 %v1823_v31 }
 0x154   :  { %501 = vmatpush1.bf16.msra.mxu0 %v1816_v29  ;;  %542 = vmatpush1.bf16.msra.mxu1 %v1827_v32 }
 0x155   :  { %606 = vmatprep.subr.bf16.mxu0 %v1735_v1  ;;  %647 = vmatprep.subr.bf16.mxu1 %v1748_v6 }
 0x1f7   :  { %v400_v43 = vpop.f32.mrf.mxu0  ;;  %v441_v44 = vpop.f32.mrf.mxu1 }
 0x1f8   :  { %v448_v45 = vadd.f32 %v400_v43, %v362_v41  ;;  %v450_v61 = vadd.f32 %v441_v44, %v364_v58 }
 0x1f9   :  { %v402_v46 = vpop.f32.mrf.mxu0  ;;  %v443_v47 = vpop.f32.mrf.mxu1 }
 0x1fa   :  { %v1379_v48 = vmul.f32 -1.442695, %v448_v45  ;;  %v449_v49 = vadd.f32 %v402_v46, %v363_v42  ;;  %v451_v57 = vadd.f32 %v443_v47, %v365_v56 }
 0x1fb   :  { %v404_v50 = vpop.f32.mrf.mxu0  ;;  %v445_v51 = vpop.f32.mrf.mxu1 }
 0x1fc   :  { %1477 = vpow2.f32 %v1379_v48  ;;  %v1380_v52 = vmul.f32 -1.442695, %v449_v49  ;;  %v1381_v59 = vmul.f32 -1.442695, %v451_v57 }
 0x1fd   :  { %v405_v53 = vpop.f32.mrf.mxu0  ;;  %v446_v54 = vpop.f32.mrf.mxu1 }
 0x1fe   :  { %1479 = vpow2.f32 %v1380_v52 }
 0x1ff   :  { %1481 = vpow2.f32 %v1381_v59 }
 0x209   :  { %v1478_v60 = vpop.eup %1477 }
 0x20a   :  { %v455_v62 = vadd.f32 1.0, %v1478_v60 }
 0x20b   :  { %v1480_v63 = vpop.eup %1479 }
 0x20c   :  { %1483 = vrcp.f32 %v455_v62  ;;  %v461_v33 = vadd.f32 1.0, %v1480_v63  ;;  %v1482_v34 = vpop.eup %1481 }
 0x20d   :  { %1485 = vtanh.f32 %v450_v61  ;;  %v468_v39 = vadd.f32 1.0, %v1482_v34  ;;  %v481_v61 = vld [vmem:[#allocation6 + $0x28] sm:$0xff] }
 0x20e   :  { %1487 = vrcp.f32 %v461_v33  ;;  %v485_v62 = vunpack.c.h.bf16 %v481_v61  ;;  %v484_v33 = vunpack.c.l.bf16 %v481_v61 }
 0x20f   :  { %1489 = vrcp.f32 %v468_v39 }
 0x219   :  { %v1484_v36 = vpop.eup %1483 }
 0x21a   :  { %v1486_v37 = vpop.eup %1485 }
 0x21b   :  { %v1488_v38 = vpop.eup %1487  ;;  %v472_v40 = vmul.f32 %v1486_v37, %v1484_v36 }
 0x21c   :  { %v471_v41 = vmul.f32 %v1488_v38, %v1867_v35  ;;  %v1490_v43 = vpop.eup %1489  ;;  %v480_v35 = vld [vmem:[#allocation6 + $0x20] sm:$0xff] }
 0x21d   :  { %v482_v47 = vunpack.c.l.bf16 %v480_v35  ;;  %v483_v48 = vunpack.c.h.bf16 %v480_v35 }
 0x21e   :  { %v1905_v42 = vadd.f32 %v472_v40, %v471_v41 }
 0x220   :  { %1491 = vtanh.f32 %v1905_v42 }
 0x22d   :  { %v1492_v44 = vpop.eup %1491 }
 0x22e   :  { %v475_v45 = vmul.f32 %v1492_v44, %v1490_v43 }
 0x230   :  { %v476_v46 = vpack.c.bf16 %v475_v45, %v475_v45 }
 0x232   :  { %478 = vst [vmem:[#allocation9 + $0x4] sm:$0xf] %v476_v46  ;;  %519 = vmatmul.mubr.bf16.vlgmr.msra.gmra.mxu0 %v476_v46  ;;  %560 = vmatmul.mubr.bf16.vlgmr.msra.gmra.mxu1 %v476_v46 }
 0x233   :  { %607 = vmatpush1.bf16.msra.mxu0 %v1737_v2  ;;  %648 = vmatpush1.bf16.msra.mxu1 %v1750_v7 }
 0x234   :  { %608 = vmatprep.subr.bf16.mxu0 %v1740_v3  ;;  %649 = vmatprep.subr.bf16.mxu1 %v1760_v10 }
 0x235   :  { %638 = vmatprep.mubr.bf16.mxu0 %v1707_v0  ;;  %679 = vmatprep.mubr.bf16.mxu1 %v1707_v0 }
 0x237   :  { %609 = vmatpush1.bf16.msra.mxu0 %v1743_v4  ;;  %650 = vmatpush1.bf16.msra.mxu1 %v1762_v11 }
 0x238   :  { %610 = vmatprep.subr.bf16.mxu0 %v1746_v5  ;;  %651 = vmatprep.subr.bf16.mxu1 %v1770_v14 }
 0x23b   :  { %611 = vmatpush1.bf16.msra.mxu0 %v1753_v8  ;;  %652 = vmatpush1.bf16.msra.mxu1 %v1774_v15 }
 0x23c   :  { %612 = vmatprep.subr.bf16.mxu0 %v1757_v9  ;;  %653 = vmatprep.subr.bf16.mxu1 %v1777_v16 }
 0x23f   :  { %613 = vmatpush1.bf16.msra.mxu0 %v1766_v12  ;;  %654 = vmatpush1.bf16.msra.mxu1 %v1786_v19 }
 0x240   :  { %614 = vmatprep.subr.bf16.mxu0 %v1768_v13  ;;  %655 = vmatprep.subr.bf16.mxu1 %v1789_v20 }
 0x243   :  { %615 = vmatpush1.bf16.msra.mxu0 %v1780_v17  ;;  %656 = vmatpush1.bf16.msra.mxu1 %v1798_v23 }
 0x244   :  { %616 = vmatprep.subr.bf16.mxu0 %v1783_v18  ;;  %657 = vmatprep.subr.bf16.mxu1 %v1801_v24 }
 0x247   :  { %617 = vmatpush1.bf16.msra.mxu0 %v1792_v21  ;;  %658 = vmatpush1.bf16.msra.mxu1 %v1810_v27 }
 0x248   :  { %618 = vmatprep.subr.bf16.mxu0 %v1794_v22  ;;  %659 = vmatprep.subr.bf16.mxu1 %v1813_v28 }
 0x24b   :  { %619 = vmatpush1.bf16.msra.mxu0 %v1804_v25  ;;  %660 = vmatpush1.bf16.msra.mxu1 %v1820_v30 }
 0x24c   :  { %620 = vmatprep.subr.bf16.mxu0 %v1807_v26  ;;  %661 = vmatprep.subr.bf16.mxu1 %v1823_v31 }
 0x24f   :  { %621 = vmatpush1.bf16.msra.mxu0 %v1816_v29  ;;  %662 = vmatpush1.bf16.msra.mxu1 %v1827_v32 }
 0x250   :  { %726 = vmatprep.subr.bf16.mxu0 %v1735_v1  ;;  %767 = vmatprep.subr.bf16.mxu1 %v1748_v6 }
 0x2f2   :  { %v520_v49 = vpop.f32.mrf.mxu0  ;;  %v561_v50 = vpop.f32.mrf.mxu1 }
 0x2f3   :  { %v568_v51 = vadd.f32 %v520_v49, %v482_v47  ;;  %v570_v37 = vadd.f32 %v561_v50, %v484_v33 }
 0x2f4   :  { %v522_v52 = vpop.f32.mrf.mxu0  ;;  %v563_v53 = vpop.f32.mrf.mxu1 }
 0x2f5   :  { %v1382_v54 = vmul.f32 -1.442695, %v568_v51  ;;  %v569_v55 = vadd.f32 %v522_v52, %v483_v48  ;;  %v571_v63 = vadd.f32 %v563_v53, %v485_v62 }
 0x2f6   :  { %v524_v56 = vpop.f32.mrf.mxu0  ;;  %v565_v57 = vpop.f32.mrf.mxu1 }
 0x2f7   :  { %1493 = vpow2.f32 %v1382_v54  ;;  %v1383_v58 = vmul.f32 -1.442695, %v569_v55  ;;  %v1384_v34 = vmul.f32 -1.442695, %v571_v63 }
 0x2f8   :  { %v525_v59 = vpop.f32.mrf.mxu0  ;;  %v566_v60 = vpop.f32.mrf.mxu1 }
 0x2f9   :  { %1495 = vpow2.f32 %v1383_v58 }
 0x2fa   :  { %1497 = vpow2.f32 %v1384_v34 }
 0x304   :  { %v1494_v36 = vpop.eup %1493 }
 0x305   :  { %v575_v38 = vadd.f32 1.0, %v1494_v36 }
 0x306   :  { %v1496_v39 = vpop.eup %1495 }
 0x307   :  { %1499 = vrcp.f32 %v575_v38  ;;  %v581_v40 = vadd.f32 1.0, %v1496_v39  ;;  %v1498_v41 = vpop.eup %1497 }
 0x308   :  { %1501 = vtanh.f32 %v570_v37  ;;  %v588_v46 = vadd.f32 1.0, %v1498_v41  ;;  %v601_v37 = vld [vmem:[#allocation6 + $0x38] sm:$0xff] }
 0x309   :  { %1503 = vrcp.f32 %v581_v40  ;;  %v605_v38 = vunpack.c.h.bf16 %v601_v37  ;;  %v604_v40 = vunpack.c.l.bf16 %v601_v37 }
 0x30a   :  { %1505 = vrcp.f32 %v588_v46 }
 0x314   :  { %v1500_v43 = vpop.eup %1499 }
 0x315   :  { %v1502_v44 = vpop.eup %1501 }
 0x316   :  { %v1504_v45 = vpop.eup %1503  ;;  %v592_v35 = vmul.f32 %v1502_v44, %v1500_v43 }
 0x317   :  { %v591_v47 = vmul.f32 %v1504_v45, %v1905_v42  ;;  %v1506_v49 = vpop.eup %1505  ;;  %v600_v42 = vld [vmem:[#allocation6 + $0x30] sm:$0xff] }
 0x318   :  { %v602_v53 = vunpack.c.l.bf16 %v600_v42  ;;  %v603_v54 = vunpack.c.h.bf16 %v600_v42 }
 0x319   :  { %v1943_v48 = vadd.f32 %v592_v35, %v591_v47 }
 0x31b   :  { %1507 = vtanh.f32 %v1943_v48 }
 0x328   :  { %v1508_v50 = vpop.eup %1507 }
 0x329   :  { %v595_v51 = vmul.f32 %v1508_v50, %v1506_v49 }
 0x32b   :  { %v596_v52 = vpack.c.bf16 %v595_v51, %v595_v51 }
 0x32d   :  { %598 = vst [vmem:[#allocation9 + $0x8] sm:$0xf] %v596_v52  ;;  %639 = vmatmul.mubr.bf16.vlgmr.msra.gmra.mxu0 %v596_v52  ;;  %680 = vmatmul.mubr.bf16.vlgmr.msra.gmra.mxu1 %v596_v52 }
 0x32e   :  { %727 = vmatpush1.bf16.msra.mxu0 %v1737_v2  ;;  %768 = vmatpush1.bf16.msra.mxu1 %v1750_v7 }
 0x32f   :  { %728 = vmatprep.subr.bf16.mxu0 %v1740_v3  ;;  %769 = vmatprep.subr.bf16.mxu1 %v1760_v10 }
 0x330   :  { %758 = vmatprep.mubr.bf16.mxu0 %v1707_v0  ;;  %799 = vmatprep.mubr.bf16.mxu1 %v1707_v0 }
 0x332   :  { %729 = vmatpush1.bf16.msra.mxu0 %v1743_v4  ;;  %770 = vmatpush1.bf16.msra.mxu1 %v1762_v11 }
 0x333   :  { %730 = vmatprep.subr.bf16.mxu0 %v1746_v5  ;;  %771 = vmatprep.subr.bf16.mxu1 %v1770_v14 }
 0x336   :  { %731 = vmatpush1.bf16.msra.mxu0 %v1753_v8  ;;  %772 = vmatpush1.bf16.msra.mxu1 %v1774_v15 }
 0x337   :  { %732 = vmatprep.subr.bf16.mxu0 %v1757_v9  ;;  %773 = vmatprep.subr.bf16.mxu1 %v1777_v16 }
 0x33a   :  { %733 = vmatpush1.bf16.msra.mxu0 %v1766_v12  ;;  %774 = vmatpush1.bf16.msra.mxu1 %v1786_v19 }
 0x33b   :  { %734 = vmatprep.subr.bf16.mxu0 %v1768_v13  ;;  %775 = vmatprep.subr.bf16.mxu1 %v1789_v20 }
 0x33e   :  { %735 = vmatpush1.bf16.msra.mxu0 %v1780_v17  ;;  %776 = vmatpush1.bf16.msra.mxu1 %v1798_v23 }
 0x33f   :  { %736 = vmatprep.subr.bf16.mxu0 %v1783_v18  ;;  %777 = vmatprep.subr.bf16.mxu1 %v1801_v24 }
 0x342   :  { %737 = vmatpush1.bf16.msra.mxu0 %v1792_v21  ;;  %778 = vmatpush1.bf16.msra.mxu1 %v1810_v27 }
 0x343   :  { %738 = vmatprep.subr.bf16.mxu0 %v1794_v22  ;;  %779 = vmatprep.subr.bf16.mxu1 %v1813_v28 }
 0x346   :  { %739 = vmatpush1.bf16.msra.mxu0 %v1804_v25  ;;  %780 = vmatpush1.bf16.msra.mxu1 %v1820_v30 }
 0x347   :  { %740 = vmatprep.subr.bf16.mxu0 %v1807_v26  ;;  %781 = vmatprep.subr.bf16.mxu1 %v1823_v31 }
 0x34a   :  { %741 = vmatpush1.bf16.msra.mxu0 %v1816_v29  ;;  %782 = vmatpush1.bf16.msra.mxu1 %v1827_v32 }
 0x34b   :  { %846 = vmatprep.subr.bf16.mxu0 %v1735_v1  ;;  %887 = vmatprep.subr.bf16.mxu1 %v1748_v6 }
 0x3ed   :  { %v640_v55 = vpop.f32.mrf.mxu0  ;;  %v681_v56 = vpop.f32.mrf.mxu1 }
 0x3ee   :  { %v688_v57 = vadd.f32 %v640_v55, %v602_v53  ;;  %v690_v44 = vadd.f32 %v681_v56, %v604_v40 }
 0x3ef   :  { %v642_v58 = vpop.f32.mrf.mxu0  ;;  %v683_v59 = vpop.f32.mrf.mxu1 }
 0x3f0   :  { %v1385_v60 = vmul.f32 -1.442695, %v688_v57  ;;  %v689_v61 = vadd.f32 %v642_v58, %v603_v54  ;;  %v691_v39 = vadd.f32 %v683_v59, %v605_v38 }
 0x3f1   :  { %v644_v62 = vpop.f32.mrf.mxu0  ;;  %v685_v63 = vpop.f32.mrf.mxu1 }
 0x3f2   :  { %1509 = vpow2.f32 %v1385_v60  ;;  %v1386_v33 = vmul.f32 -1.442695, %v689_v61  ;;  %v1387_v41 = vmul.f32 -1.442695, %v691_v39 }
 0x3f3   :  { %v645_v34 = vpop.f32.mrf.mxu0  ;;  %v686_v36 = vpop.f32.mrf.mxu1 }
 0x3f4   :  { %1511 = vpow2.f32 %v1386_v33 }
 0x3f5   :  { %1513 = vpow2.f32 %v1387_v41 }
 0x3ff   :  { %v1510_v43 = vpop.eup %1509 }
 0x400   :  { %v695_v45 = vadd.f32 1.0, %v1510_v43 }
 0x401   :  { %v1512_v46 = vpop.eup %1511 }
 0x402   :  { %1515 = vrcp.f32 %v695_v45  ;;  %v701_v35 = vadd.f32 1.0, %v1512_v46  ;;  %v1514_v47 = vpop.eup %1513 }
 0x403   :  { %1517 = vtanh.f32 %v690_v44  ;;  %v708_v52 = vadd.f32 1.0, %v1514_v47  ;;  %v721_v44 = vld [vmem:[#allocation6 + $0x48] sm:$0xff] }
 0x404   :  { %1519 = vrcp.f32 %v701_v35  ;;  %v724_v45 = vunpack.c.l.bf16 %v721_v44 }
 0x405   :  { %1521 = vrcp.f32 %v708_v52 }
 0x40f   :  { %v1516_v49 = vpop.eup %1515 }
 0x410   :  { %v1518_v50 = vpop.eup %1517 }
 0x411   :  { %v1520_v51 = vpop.eup %1519  ;;  %v712_v42 = vmul.f32 %v1518_v50, %v1516_v49 }
 0x412   :  { %v711_v53 = vmul.f32 %v1520_v51, %v1943_v48  ;;  %v1522_v55 = vpop.eup %1521  ;;  %v720_v48 = vld [vmem:[#allocation6 + $0x40] sm:$0xff] }
 0x413   :  { %v722_v59 = vunpack.c.l.bf16 %v720_v48  ;;  %v723_v60 = vunpack.c.h.bf16 %v720_v48 }
 0x414   :  { %v1981_v54 = vadd.f32 %v712_v42, %v711_v53 }
 0x416   :  { %1523 = vtanh.f32 %v1981_v54 }
 0x423   :  { %v1524_v56 = vpop.eup %1523 }
 0x424   :  { %v715_v57 = vmul.f32 %v1524_v56, %v1522_v55 }
 0x426   :  { %v716_v58 = vpack.c.bf16 %v715_v57, %v715_v57 }
 0x428   :  { %718 = vst [vmem:[#allocation9 + $0xc] sm:$0xf] %v716_v58  ;;  %759 = vmatmul.mubr.bf16.vlgmr.msra.gmra.mxu0 %v716_v58  ;;  %800 = vmatmul.mubr.bf16.vlgmr.msra.gmra.mxu1 %v716_v58 }
 0x429   :  { %847 = vmatpush1.bf16.msra.mxu0 %v1737_v2  ;;  %888 = vmatpush1.bf16.msra.mxu1 %v1750_v7 }
 0x42a   :  { %848 = vmatprep.subr.bf16.mxu0 %v1740_v3  ;;  %889 = vmatprep.subr.bf16.mxu1 %v1760_v10 }
 0x42b   :  { %878 = vmatprep.mubr.bf16.mxu0 %v1707_v0  ;;  %919 = vmatprep.mubr.bf16.mxu1 %v1707_v0 }
 0x42d   :  { %849 = vmatpush1.bf16.msra.mxu0 %v1743_v4  ;;  %890 = vmatpush1.bf16.msra.mxu1 %v1762_v11 }
 0x42e   :  { %850 = vmatprep.subr.bf16.mxu0 %v1746_v5  ;;  %891 = vmatprep.subr.bf16.mxu1 %v1770_v14 }
 0x431   :  { %851 = vmatpush1.bf16.msra.mxu0 %v1753_v8  ;;  %892 = vmatpush1.bf16.msra.mxu1 %v1774_v15 }
 0x432   :  { %852 = vmatprep.subr.bf16.mxu0 %v1757_v9  ;;  %893 = vmatprep.subr.bf16.mxu1 %v1777_v16 }
 0x435   :  { %853 = vmatpush1.bf16.msra.mxu0 %v1766_v12  ;;  %894 = vmatpush1.bf16.msra.mxu1 %v1786_v19 }
 0x436   :  { %854 = vmatprep.subr.bf16.mxu0 %v1768_v13  ;;  %895 = vmatprep.subr.bf16.mxu1 %v1789_v20 }
 0x439   :  { %855 = vmatpush1.bf16.msra.mxu0 %v1780_v17  ;;  %896 = vmatpush1.bf16.msra.mxu1 %v1798_v23 }
 0x43a   :  { %856 = vmatprep.subr.bf16.mxu0 %v1783_v18  ;;  %897 = vmatprep.subr.bf16.mxu1 %v1801_v24 }
 0x43d   :  { %857 = vmatpush1.bf16.msra.mxu0 %v1792_v21  ;;  %898 = vmatpush1.bf16.msra.mxu1 %v1810_v27 }
 0x43e   :  { %858 = vmatprep.subr.bf16.mxu0 %v1794_v22  ;;  %899 = vmatprep.subr.bf16.mxu1 %v1813_v28 }
 0x441   :  { %859 = vmatpush1.bf16.msra.mxu0 %v1804_v25  ;;  %900 = vmatpush1.bf16.msra.mxu1 %v1820_v30 }
 0x442   :  { %860 = vmatprep.subr.bf16.mxu0 %v1807_v26  ;;  %901 = vmatprep.subr.bf16.mxu1 %v1823_v31 }
 0x445   :  { %861 = vmatpush1.bf16.msra.mxu0 %v1816_v29  ;;  %902 = vmatpush1.bf16.msra.mxu1 %v1827_v32 }
 0x446   :  { %966 = vmatprep.subr.bf16.mxu0 %v1735_v1  ;;  %1007 = vmatprep.subr.bf16.mxu1 %v1748_v6  ;;  %v725_v1 = vunpack.c.h.bf16 %v721_v44  ;;  %v2070_v44 = vld [vmem:[#allocation4 + $0xc4] ss:$16 sps:$4 sm:$0xff]  }
 0x4e8   :  { %v760_v61 = vpop.f32.mrf.mxu0  ;;  %v801_v62 = vpop.f32.mrf.mxu1 }
 0x4e9   :  { %v808_v63 = vadd.f32 %v760_v61, %v722_v59  ;;  %v810_v47 = vadd.f32 %v801_v62, %v724_v45  ;;  %v2081_v45 = vld [vmem:[#allocation4 + $0xc8] ss:$16 sps:$4 sm:$0xff]  }
 0x4ea   :  { %v762_v33 = vpop.f32.mrf.mxu0  ;;  %v803_v34 = vpop.f32.mrf.mxu1 }
 0x4eb   :  { %v1388_v36 = vmul.f32 -1.442695, %v808_v63  ;;  %v809_v37 = vadd.f32 %v762_v33, %v723_v60  ;;  %v811_v6 = vadd.f32 %v803_v34, %v725_v1  ;;  %v2073_v1 = vld [vmem:[#allocation4 + $0xcc] ss:$16 sps:$4 sm:$0xff]  }
 0x4ec   :  { %v764_v38 = vpop.f32.mrf.mxu0  ;;  %v805_v39 = vpop.f32.mrf.mxu1 }
 0x4ed   :  { %1525 = vpow2.f32 %v1388_v36  ;;  %v1389_v40 = vmul.f32 -1.442695, %v809_v37  ;;  %v1390_v46 = vmul.f32 -1.442695, %v811_v6  ;;  %v2078_v6 = vld [vmem:[#allocation4 + $0xc0] ss:$16 sps:$4 sm:$0xff]  }
 0x4ee   :  { %v765_v41 = vpop.f32.mrf.mxu0  ;;  %v806_v43 = vpop.f32.mrf.mxu1 }
 0x4ef   :  { %1527 = vpow2.f32 %v1389_v40  ;;  %v2064_v41 = vld [vmem:[#allocation4 + $0xe0] ss:$16 sps:$4 sm:$0xff]   ;;  %v2067_v43 = vld [vmem:[#allocation4 + $0xe8] ss:$16 sps:$4 sm:$0xff]  }
 0x4f0   :  { %1529 = vpow2.f32 %v1390_v46  ;;  %v2084_v46 = vld [vmem:[#allocation4 + $0xa4] ss:$16 sps:$4 sm:$0xff]  }
 0x4fa   :  { %v1526_v35 = vpop.eup %1525 }
 0x4fb   :  { %v815_v49 = vadd.f32 1.0, %v1526_v35  ;;  %v2087_v35 = vld [vmem:[#allocation4 + $0xac] ss:$16 sps:$4 sm:$0xff]  }
 0x4fc   :  { %v1528_v50 = vpop.eup %1527 }
 0x4fd   :  { %1531 = vrcp.f32 %v815_v49  ;;  %v821_v51 = vadd.f32 1.0, %v1528_v50  ;;  %v1530_v52 = vpop.eup %1529  ;;  %v2093_v49 = vld [vmem:[#allocation4 + $0xa8] ss:$16 sps:$4 sm:$0xff]   ;;  %v2096_v50 = vld [vmem:[#allocation4 + $0x84] ss:$16 sps:$4 sm:$0xff]  }
 0x4fe   :  { %1533 = vtanh.f32 %v810_v47  ;;  %v828_v56 = vadd.f32 1.0, %v1530_v52  ;;  %v2090_v47 = vld [vmem:[#allocation4 + $0xa0] ss:$16 sps:$4 sm:$0xff]  }
 0x4ff   :  { %1535 = vrcp.f32 %v821_v51  ;;  %v2099_v51 = vld [vmem:[#allocation4 + $0x8c] ss:$16 sps:$4 sm:$0xff]   ;;  %v2102_v52 = vld [vmem:[#allocation4 + $0x80] ss:$16 sps:$4 sm:$0xff]  }
 0x500   :  { %1537 = vrcp.f32 %v828_v56  ;;  %v2114_v56 = vld [vmem:[#allocation4 + $0x60] ss:$16 sps:$4 sm:$0xff]  }
 0x50a   :  { %v1532_v42 = vpop.eup %1531 }
 0x50b   :  { %v1534_v53 = vpop.eup %1533 }
 0x50c   :  { %v1536_v55 = vpop.eup %1535  ;;  %v832_v57 = vmul.f32 %v1534_v53, %v1532_v42  ;;  %v2105_v42 = vld [vmem:[#allocation4 + $0x88] ss:$16 sps:$4 sm:$0xff]   ;;  %v2108_v53 = vld [vmem:[#allocation4 + $0x64] ss:$16 sps:$4 sm:$0xff]  }
 0x50d   :  { %v831_v58 = vmul.f32 %v1536_v55, %v1981_v54  ;;  %v1538_v59 = vpop.eup %1537  ;;  %v2111_v55 = vld [vmem:[#allocation4 + $0x6c] ss:$16 sps:$4 sm:$0xff]  }
 0x50f   :  { %v2019_v48 = vadd.f32 %v832_v57, %v831_v58  ;;  %v2117_v57 = vld [vmem:[#allocation4 + $0x68] ss:$16 sps:$4 sm:$0xff]   ;;  %v2120_v58 = vld [vmem:[#allocation4 + $0x44] ss:$16 sps:$4 sm:$0xff]  }
 0x511   :  { %1539 = vtanh.f32 %v2019_v48 }
 0x51e   :  { %v1540_v60 = vpop.eup %1539 }
 0x51f   :  { %v835_v61 = vmul.f32 %v1540_v60, %v1538_v59  ;;  %v2126_v59 = vld [vmem:[#allocation4 + $0x40] ss:$16 sps:$4 sm:$0xff]   ;;  %v2129_v60 = vld [vmem:[#allocation4 + $0x48] ss:$16 sps:$4 sm:$0xff]  }
 0x521   :  { %v836_v62 = vpack.c.bf16 %v835_v61, %v835_v61  ;;  %v2132_v61 = vld [vmem:[#allocation4 + $0x24] ss:$16 sps:$4 sm:$0xff]  }
 0x523   :  { %838 = vst [vmem:[#allocation9 + $0x10] sm:$0xf] %v836_v62  ;;  %879 = vmatmul.mubr.bf16.vlgmr.msra.gmra.mxu0 %v836_v62  ;;  %920 = vmatmul.mubr.bf16.vlgmr.msra.gmra.mxu1 %v836_v62  ;;  %v2135_v62 = vld [vmem:[#allocation4 + $0x2c] ss:$16 sps:$4 sm:$0xff]  }
 0x524   :  { %967 = vmatpush1.bf16.msra.mxu0 %v1737_v2  ;;  %1008 = vmatpush1.bf16.msra.mxu1 %v1750_v7  ;;  %v2054_v2 = vld [vmem:[#allocation4 + $0xe4] ss:$16 sps:$4 sm:$0xff]  }
 0x525   :  { %968 = vmatprep.subr.bf16.mxu0 %v1740_v3  ;;  %1009 = vmatprep.subr.bf16.mxu1 %v1760_v10  ;;  %v2057_v3 = vld [vmem:[#allocation4 + $0xec] ss:$16 sps:$4 sm:$0xff]  }
 0x526   :  { %998 = vmatprep.mubr.bf16.mxu0 %v1707_v0  ;;  %1039 = vmatprep.mubr.bf16.mxu1 %v1707_v0 }
 0x528   :  { %969 = vmatpush1.bf16.msra.mxu0 %v1743_v4  ;;  %1010 = vmatpush1.bf16.msra.mxu1 %v1762_v11  ;;  %v840_v4 = vld [vmem:[#allocation6 + $0x50] sm:$0xff] }
 0x529   :  { %970 = vmatprep.subr.bf16.mxu0 %v1746_v5  ;;  %1011 = vmatprep.subr.bf16.mxu1 %v1770_v14  ;;  %v842_v5 = vunpack.c.l.bf16 %v840_v4  ;;  %v843_v7 = vunpack.c.h.bf16 %v840_v4  ;;  %v2138_v4 = vld [vmem:[#allocation4 + $0x20] ss:$16 sps:$4 sm:$0xff]  }
 0x52c   :  { %971 = vmatpush1.bf16.msra.mxu0 %v1753_v8  ;;  %1012 = vmatpush1.bf16.msra.mxu1 %v1774_v15 }
 0x52d   :  { %972 = vmatprep.subr.bf16.mxu0 %v1757_v9  ;;  %1013 = vmatprep.subr.bf16.mxu1 %v1777_v16 }
 0x530   :  { %973 = vmatpush1.bf16.msra.mxu0 %v1766_v12  ;;  %1014 = vmatpush1.bf16.msra.mxu1 %v1786_v19 }
 0x531   :  { %974 = vmatprep.subr.bf16.mxu0 %v1768_v13  ;;  %1015 = vmatprep.subr.bf16.mxu1 %v1789_v20  ;;  %v841_v20 = vld [vmem:[#allocation6 + $0x58] sm:$0xff] }
 0x534   :  { %975 = vmatpush1.bf16.msra.mxu0 %v1780_v17  ;;  %1016 = vmatpush1.bf16.msra.mxu1 %v1798_v23  ;;  %v844_v23 = vunpack.c.l.bf16 %v841_v20 }
 0x535   :  { %976 = vmatprep.subr.bf16.mxu0 %v1783_v18  ;;  %1017 = vmatprep.subr.bf16.mxu1 %v1801_v24 }
 0x538   :  { %977 = vmatpush1.bf16.msra.mxu0 %v1792_v21  ;;  %1018 = vmatpush1.bf16.msra.mxu1 %v1810_v27  ;;  %v845_v21 = vunpack.c.h.bf16 %v841_v20 }
 0x539   :  { %978 = vmatprep.subr.bf16.mxu0 %v1794_v22  ;;  %1019 = vmatprep.subr.bf16.mxu1 %v1813_v28 }
 0x53c   :  { %979 = vmatpush1.bf16.msra.mxu0 %v1804_v25  ;;  %1020 = vmatpush1.bf16.msra.mxu1 %v1820_v30 }
 0x53d   :  { %980 = vmatprep.subr.bf16.mxu0 %v1807_v26  ;;  %1021 = vmatprep.subr.bf16.mxu1 %v1823_v31 }
 0x540   :  { %981 = vmatpush1.bf16.msra.mxu0 %v1816_v29  ;;  %1022 = vmatpush1.bf16.msra.mxu1 %v1827_v32 }
 0x541   :  { %1086 = vmatprep.subr.bf16.mxu0 %v2054_v2  ;;  %1127 = vmatprep.subr.bf16.mxu1 %v2057_v3 }
 0x5e3   :  { %v880_v8 = vpop.f32.mrf.mxu0  ;;  %v921_v9 = vpop.f32.mrf.mxu1 }
 0x5e4   :  { %v928_v10 = vadd.f32 %v880_v8, %v842_v5  ;;  %v930_v26 = vadd.f32 %v921_v9, %v844_v23  ;;  %v2141_v5 = vld [vmem:[#allocation4 + $0x28] ss:$16 sps:$4 sm:$0xff]   ;;  %v2147_v8 = vld [vmem:[#allocation4 + $0xc] ss:$16 sps:$4 sm:$0xff]   ;;  %v2150_v9 = vld [vmem:[#allocation4] ss:$16 sps:$4 sm:$0xff]  }
 0x5e5   :  { %v882_v11 = vpop.f32.mrf.mxu0  ;;  %v923_v12 = vpop.f32.mrf.mxu1 }
 0x5e6   :  { %v1391_v13 = vmul.f32 -1.442695, %v928_v10  ;;  %v929_v14 = vadd.f32 %v882_v11, %v843_v7  ;;  %v931_v22 = vadd.f32 %v923_v12, %v845_v21  ;;  %v2144_v7 = vld [vmem:[#allocation4 + $0x4] ss:$16 sps:$4 sm:$0xff]   ;;  %v2153_v10 = vld [vmem:[#allocation4 + $0x8] ss:$16 sps:$4 sm:$0xff]  }
 0x5e7   :  { %v884_v15 = vpop.f32.mrf.mxu0  ;;  %v925_v16 = vpop.f32.mrf.mxu1  ;;  %v960_v11 = vld [vmem:[#allocation6 + $0x60] sm:$0xff] }
 0x5e8   :  { %1541 = vpow2.f32 %v1391_v13  ;;  %v1392_v17 = vmul.f32 -1.442695, %v929_v14  ;;  %v1393_v24 = vmul.f32 -1.442695, %v931_v22  ;;  %v962_v12 = vunpack.c.l.bf16 %v960_v11 }
 0x5e9   :  { %v885_v18 = vpop.f32.mrf.mxu0  ;;  %v926_v19 = vpop.f32.mrf.mxu1  ;;  %v963_v13 = vunpack.c.h.bf16 %v960_v11 }
 0x5ea   :  { %1543 = vpow2.f32 %v1392_v17 }
 0x5eb   :  { %1545 = vpow2.f32 %v1393_v24 }
 0x5f5   :  { %v1542_v25 = vpop.eup %1541 }
 0x5f6   :  { %v935_v27 = vadd.f32 1.0, %v1542_v25 }
 0x5f7   :  { %v1544_v28 = vpop.eup %1543 }
 0x5f8   :  { %1547 = vrcp.f32 %v935_v27  ;;  %v941_v29 = vadd.f32 1.0, %v1544_v28  ;;  %v1546_v30 = vpop.eup %1545 }
 0x5f9   :  { %1549 = vtanh.f32 %v930_v26  ;;  %v948_v63 = vadd.f32 1.0, %v1546_v30  ;;  %v961_v26 = vld [vmem:[#allocation6 + $0x68] sm:$0xff] }
 0x5fa   :  { %1551 = vrcp.f32 %v941_v29  ;;  %v964_v27 = vunpack.c.l.bf16 %v961_v26 }
 0x5fb   :  { %1553 = vrcp.f32 %v948_v63 }
 0x605   :  { %v1548_v31 = vpop.eup %1547 }
 0x606   :  { %v1550_v32 = vpop.eup %1549 }
 0x607   :  { %v1552_v54 = vpop.eup %1551  ;;  %v952_v33 = vmul.f32 %v1550_v32, %v1548_v31 }
 0x608   :  { %v951_v34 = vmul.f32 %v1552_v54, %v2019_v48  ;;  %v1554_v37 = vpop.eup %1553  ;;  %v2123_v48 = vld [vmem:[#allocation4 + $0x4c] ss:$16 sps:$4 sm:$0xff]  }
 0x60a   :  { %v2061_v36 = vadd.f32 %v952_v33, %v951_v34 }
 0x60c   :  { %1555 = vtanh.f32 %v2061_v36 }
 0x619   :  { %v1556_v38 = vpop.eup %1555 }
 0x61a   :  { %v955_v39 = vmul.f32 %v1556_v38, %v1554_v37 }
 0x61c   :  { %v956_v40 = vpack.c.bf16 %v955_v39, %v955_v39 }
 0x61e   :  { %958 = vst [vmem:[#allocation9 + $0x14] sm:$0xf] %v956_v40  ;;  %999 = vmatmul.mubr.bf16.vlgmr.msra.gmra.mxu0 %v956_v40  ;;  %1040 = vmatmul.mubr.bf16.vlgmr.msra.gmra.mxu1 %v956_v40 }
 0x61f   :  { %1087 = vmatpush1.bf16.msra.mxu0 %v2064_v41  ;;  %1128 = vmatpush1.bf16.msra.mxu1 %v2067_v43 }
 0x620   :  { %1088 = vmatprep.subr.bf16.mxu0 %v2070_v44  ;;  %1129 = vmatprep.subr.bf16.mxu1 %v2073_v1 }
 0x621   :  { %1118 = vmatprep.mubr.bf16.mxu0 %v1707_v0  ;;  %1159 = vmatprep.mubr.bf16.mxu1 %v1707_v0 }
 0x623   :  { %1089 = vmatpush1.bf16.msra.mxu0 %v2078_v6  ;;  %1130 = vmatpush1.bf16.msra.mxu1 %v2081_v45 }
 0x624   :  { %1090 = vmatprep.subr.bf16.mxu0 %v2084_v46  ;;  %1131 = vmatprep.subr.bf16.mxu1 %v2087_v35 }
 0x627   :  { %1091 = vmatpush1.bf16.msra.mxu0 %v2090_v47  ;;  %1132 = vmatpush1.bf16.msra.mxu1 %v2093_v49 }
 0x628   :  { %1092 = vmatprep.subr.bf16.mxu0 %v2096_v50  ;;  %1133 = vmatprep.subr.bf16.mxu1 %v2099_v51 }
 0x62b   :  { %1093 = vmatpush1.bf16.msra.mxu0 %v2102_v52  ;;  %1134 = vmatpush1.bf16.msra.mxu1 %v2105_v42 }
 0x62c   :  { %1094 = vmatprep.subr.bf16.mxu0 %v2108_v53  ;;  %1135 = vmatprep.subr.bf16.mxu1 %v2111_v55 }
 0x62f   :  { %1095 = vmatpush1.bf16.msra.mxu0 %v2114_v56  ;;  %1136 = vmatpush1.bf16.msra.mxu1 %v2117_v57 }
 0x630   :  { %1096 = vmatprep.subr.bf16.mxu0 %v2120_v58  ;;  %1137 = vmatprep.subr.bf16.mxu1 %v2123_v48 }
 0x633   :  { %1097 = vmatpush1.bf16.msra.mxu0 %v2126_v59  ;;  %1138 = vmatpush1.bf16.msra.mxu1 %v2129_v60 }
 0x634   :  { %1098 = vmatprep.subr.bf16.mxu0 %v2132_v61  ;;  %1139 = vmatprep.subr.bf16.mxu1 %v2135_v62 }
 0x637   :  { %1099 = vmatpush1.bf16.msra.mxu0 %v2138_v4  ;;  %1140 = vmatpush1.bf16.msra.mxu1 %v2141_v5 }
 0x638   :  { %1100 = vmatprep.subr.bf16.mxu0 %v2144_v7  ;;  %1141 = vmatprep.subr.bf16.mxu1 %v2147_v8 }
 0x63b   :  { %1101 = vmatpush1.bf16.msra.mxu0 %v2150_v9  ;;  %1142 = vmatpush1.bf16.msra.mxu1 %v2153_v10 }
 0x63c   :  { %1206 = vmatprep.subr.bf16.mxu0 %v2054_v2  ;;  %1247 = vmatprep.subr.bf16.mxu1 %v2057_v3  ;;  %v965_v2 = vunpack.c.h.bf16 %v961_v26 }
 0x6de   :  { %v1000_v14 = vpop.f32.mrf.mxu0  ;;  %v1041_v15 = vpop.f32.mrf.mxu1 }
 0x6df   :  { %v1048_v16 = vadd.f32 %v1000_v14, %v962_v12  ;;  %v1050_v30 = vadd.f32 %v1041_v15, %v964_v27 }
 0x6e0   :  { %v1002_v17 = vpop.f32.mrf.mxu0  ;;  %v1043_v18 = vpop.f32.mrf.mxu1 }
 0x6e1   :  { %v1394_v19 = vmul.f32 -1.442695, %v1048_v16  ;;  %v1049_v20 = vadd.f32 %v1002_v17, %v963_v13  ;;  %v1051_v3 = vadd.f32 %v1043_v18, %v965_v2 }
 0x6e2   :  { %v1004_v21 = vpop.f32.mrf.mxu0  ;;  %v1045_v22 = vpop.f32.mrf.mxu1 }
 0x6e3   :  { %1557 = vpow2.f32 %v1394_v19  ;;  %v1395_v23 = vmul.f32 -1.442695, %v1049_v20  ;;  %v1396_v28 = vmul.f32 -1.442695, %v1051_v3  ;;  %v1200_v21 = vld [vmem:[#allocation6 + $0x80] sm:$0xff] }
 0x6e4   :  { %v1005_v24 = vpop.f32.mrf.mxu0  ;;  %v1046_v25 = vpop.f32.mrf.mxu1  ;;  %v1202_v22 = vunpack.c.l.bf16 %v1200_v21 }
 0x6e5   :  { %1559 = vpow2.f32 %v1395_v23  ;;  %v1203_v23 = vunpack.c.h.bf16 %v1200_v21 }
 0x6e6   :  { %1561 = vpow2.f32 %v1396_v28 }
 0x6f0   :  { %v1558_v29 = vpop.eup %1557 }
 0x6f1   :  { %v1055_v31 = vadd.f32 1.0, %v1558_v29 }
 0x6f2   :  { %v1560_v32 = vpop.eup %1559 }
 0x6f3   :  { %1563 = vrcp.f32 %v1055_v31  ;;  %v1061_v54 = vadd.f32 1.0, %v1560_v32  ;;  %v1562_v63 = vpop.eup %1561 }
 0x6f4   :  { %1565 = vtanh.f32 %v1050_v30  ;;  %v1068_v38 = vadd.f32 1.0, %v1562_v63  ;;  %v1201_v63 = vld [vmem:[#allocation6 + $0x88] sm:$0xff] }
 0x6f5   :  { %1567 = vrcp.f32 %v1061_v54 }
 0x6f6   :  { %1569 = vrcp.f32 %v1068_v38 }
 0x700   :  { %v1564_v33 = vpop.eup %1563 }
 0x701   :  { %v1566_v34 = vpop.eup %1565 }
 0x702   :  { %v1568_v37 = vpop.eup %1567  ;;  %v1072_v39 = vmul.f32 %v1566_v34, %v1564_v33  ;;  %v1205_v33 = vunpack.c.h.bf16 %v1201_v63 }
 0x703   :  { %v1071_v40 = vmul.f32 %v1568_v37, %v2061_v36  ;;  %v1570_v12 = vpop.eup %1569  ;;  %v1204_v37 = vunpack.c.l.bf16 %v1201_v63 }
 0x705   :  { %v2159_v11 = vadd.f32 %v1072_v39, %v1071_v40 }
 0x707   :  { %1571 = vtanh.f32 %v2159_v11 }
 0x714   :  { %v1572_v13 = vpop.eup %1571 }
 0x715   :  { %v1075_v14 = vmul.f32 %v1572_v13, %v1570_v12 }
 0x717   :  { %v1076_v15 = vpack.c.bf16 %v1075_v14, %v1075_v14 }
 0x719   :  { %1078 = vst [vmem:[#allocation9 + $0x18] sm:$0xf] %v1076_v15  ;;  %1119 = vmatmul.mubr.bf16.vlgmr.msra.gmra.mxu0 %v1076_v15  ;;  %1160 = vmatmul.mubr.bf16.vlgmr.msra.gmra.mxu1 %v1076_v15 }
 0x71a   :  { %1207 = vmatpush1.bf16.msra.mxu0 %v2064_v41  ;;  %1248 = vmatpush1.bf16.msra.mxu1 %v2067_v43 }
 0x71b   :  { %1208 = vmatprep.subr.bf16.mxu0 %v2070_v44  ;;  %1249 = vmatprep.subr.bf16.mxu1 %v2073_v1 }
 0x71c   :  { %1238 = vmatprep.mubr.bf16.mxu0 %v1707_v0  ;;  %1279 = vmatprep.mubr.bf16.mxu1 %v1707_v0  ;;  %v1080_v0 = vld [vmem:[#allocation6 + $0x70] sm:$0xff] }
 0x71d   :  { %v1082_v36 = vunpack.c.l.bf16 %v1080_v0  ;;  %v1083_v41 = vunpack.c.h.bf16 %v1080_v0 }
 0x71e   :  { %1209 = vmatpush1.bf16.msra.mxu0 %v2078_v6  ;;  %1250 = vmatpush1.bf16.msra.mxu1 %v2081_v45 }
 0x71f   :  { %1210 = vmatprep.subr.bf16.mxu0 %v2084_v46  ;;  %1251 = vmatprep.subr.bf16.mxu1 %v2087_v35 }
 0x722   :  { %1211 = vmatpush1.bf16.msra.mxu0 %v2090_v47  ;;  %1252 = vmatpush1.bf16.msra.mxu1 %v2093_v49 }
 0x723   :  { %1212 = vmatprep.subr.bf16.mxu0 %v2096_v50  ;;  %1253 = vmatprep.subr.bf16.mxu1 %v2099_v51 }
 0x726   :  { %1213 = vmatpush1.bf16.msra.mxu0 %v2102_v52  ;;  %1254 = vmatpush1.bf16.msra.mxu1 %v2105_v42  ;;  %v1081_v42 = vld [vmem:[#allocation6 + $0x78] sm:$0xff] }
 0x727   :  { %1214 = vmatprep.subr.bf16.mxu0 %v2108_v53  ;;  %1255 = vmatprep.subr.bf16.mxu1 %v2111_v55  ;;  %v1085_v53 = vunpack.c.h.bf16 %v1081_v42 }
 0x72a   :  { %1215 = vmatpush1.bf16.msra.mxu0 %v2114_v56  ;;  %1256 = vmatpush1.bf16.msra.mxu1 %v2117_v57  ;;  %v1084_v56 = vunpack.c.l.bf16 %v1081_v42 }
 0x72b   :  { %1216 = vmatprep.subr.bf16.mxu0 %v2120_v58  ;;  %1257 = vmatprep.subr.bf16.mxu1 %v2123_v48 }
 0x72e   :  { %1217 = vmatpush1.bf16.msra.mxu0 %v2126_v59  ;;  %1258 = vmatpush1.bf16.msra.mxu1 %v2129_v60 }
 0x72f   :  { %1218 = vmatprep.subr.bf16.mxu0 %v2132_v61  ;;  %1259 = vmatprep.subr.bf16.mxu1 %v2135_v62 }
 0x732   :  { %1219 = vmatpush1.bf16.msra.mxu0 %v2138_v4  ;;  %1260 = vmatpush1.bf16.msra.mxu1 %v2141_v5 }
 0x733   :  { %1220 = vmatprep.subr.bf16.mxu0 %v2144_v7  ;;  %1261 = vmatprep.subr.bf16.mxu1 %v2147_v8 }
 0x736   :  { %1221 = vmatpush1.bf16.msra.mxu0 %v2150_v9  ;;  %1262 = vmatpush1.bf16.msra.mxu1 %v2153_v10 }
 0x7d9   :  { %v1120_v43 = vpop.f32.mrf.mxu0  ;;  %v1161_v44 = vpop.f32.mrf.mxu1 }
 0x7da   :  { %v1168_v1 = vadd.f32 %v1120_v43, %v1082_v36  ;;  %v1170_v48 = vadd.f32 %v1161_v44, %v1084_v56 }
 0x7db   :  { %v1122_v6 = vpop.f32.mrf.mxu0  ;;  %v1163_v45 = vpop.f32.mrf.mxu1 }
 0x7dc   :  { %v1397_v46 = vmul.f32 -1.442695, %v1168_v1  ;;  %v1169_v35 = vadd.f32 %v1122_v6, %v1083_v41  ;;  %v1171_v55 = vadd.f32 %v1163_v45, %v1085_v53 }
 0x7dd   :  { %v1124_v47 = vpop.f32.mrf.mxu0  ;;  %v1165_v49 = vpop.f32.mrf.mxu1 }
 0x7de   :  { %1573 = vpow2.f32 %v1397_v46  ;;  %v1398_v50 = vmul.f32 -1.442695, %v1169_v35  ;;  %v1399_v57 = vmul.f32 -1.442695, %v1171_v55 }
 0x7df   :  { %v1125_v51 = vpop.f32.mrf.mxu0  ;;  %v1166_v52 = vpop.f32.mrf.mxu1 }
 0x7e0   :  { %1575 = vpow2.f32 %v1398_v50 }
 0x7e1   :  { %1577 = vpow2.f32 %v1399_v57 }
 0x7eb   :  { %v1574_v58 = vpop.eup %1573 }
 0x7ec   :  { %v1175_v59 = vadd.f32 1.0, %v1574_v58 }
 0x7ed   :  { %v1576_v60 = vpop.eup %1575 }
 0x7ee   :  { %1579 = vrcp.f32 %v1175_v59  ;;  %v1181_v61 = vadd.f32 1.0, %v1576_v60  ;;  %v1578_v62 = vpop.eup %1577 }
 0x7ef   :  { %1581 = vtanh.f32 %v1170_v48  ;;  %v1188_v8 = vadd.f32 1.0, %v1578_v62 }
 0x7f0   :  { %1583 = vrcp.f32 %v1181_v61 }
 0x7f1   :  { %1585 = vrcp.f32 %v1188_v8 }
 0x7fb   :  { %v1580_v4 = vpop.eup %1579 }
 0x7fc   :  { %v1582_v5 = vpop.eup %1581 }
 0x7fd   :  { %v1584_v7 = vpop.eup %1583  ;;  %v1192_v9 = vmul.f32 %v1582_v5, %v1580_v4 }
 0x7fe   :  { %v1191_v10 = vmul.f32 %v1584_v7, %v2159_v11  ;;  %v1586_v17 = vpop.eup %1585 }
 0x800   :  { %v1193_v16 = vadd.f32 %v1192_v9, %v1191_v10 }
 0x802   :  { %1587 = vtanh.f32 %v1193_v16 }
 0x80f   :  { %v1588_v18 = vpop.eup %1587 }
 0x810   :  { %v1195_v19 = vmul.f32 %v1588_v18, %v1586_v17 }
 0x812   :  { %v1196_v20 = vpack.c.bf16 %v1195_v19, %v1195_v19 }
 0x814   :  { %1198 = vst [vmem:[#allocation9 + $0x1c] sm:$0xf] %v1196_v20  ;;  %1239 = vmatmul.mubr.bf16.vlgmr.msra.gmra.mxu0 %v1196_v20  ;;  %1280 = vmatmul.mubr.bf16.vlgmr.msra.gmra.mxu1 %v1196_v20 }
 0x8d4   :  { %v1240_v24 = vpop.f32.mrf.mxu0  ;;  %v1281_v25 = vpop.f32.mrf.mxu1 }
 0x8d5   :  { %v1288_v26 = vadd.f32 %v1240_v24, %v1202_v22  ;;  %v1290_v40 = vadd.f32 %v1281_v25, %v1204_v37 }
 0x8d6   :  { %v1242_v2 = vpop.f32.mrf.mxu0  ;;  %v1283_v3 = vpop.f32.mrf.mxu1 }
 0x8d7   :  { %v1400_v27 = vmul.f32 -1.442695, %v1288_v26  ;;  %v1289_v28 = vadd.f32 %v1242_v2, %v1203_v23  ;;  %v1291_v34 = vadd.f32 %v1283_v3, %v1205_v33 }
 0x8d8   :  { %v1244_v29 = vpop.f32.mrf.mxu0  ;;  %v1285_v30 = vpop.f32.mrf.mxu1 }
 0x8d9   :  { %1589 = vpow2.f32 %v1400_v27  ;;  %v1401_v31 = vmul.f32 -1.442695, %v1289_v28  ;;  %v1402_v38 = vmul.f32 -1.442695, %v1291_v34 }
 0x8da   :  { %v1245_v32 = vpop.f32.mrf.mxu0  ;;  %v1286_v54 = vpop.f32.mrf.mxu1 }
 0x8db   :  { %1591 = vpow2.f32 %v1401_v31 }
 0x8dc   :  { %1593 = vpow2.f32 %v1402_v38 }
 0x8e6   :  { %v1590_v39 = vpop.eup %1589 }
 0x8e7   :  { %v1295_v11 = vadd.f32 1.0, %v1590_v39 }
 0x8e8   :  { %v1592_v12 = vpop.eup %1591 }
 0x8e9   :  { %1595 = vrcp.f32 %v1295_v11  ;;  %v1301_v13 = vadd.f32 1.0, %v1592_v12  ;;  %v1594_v14 = vpop.eup %1593 }
 0x8ea   :  { %1597 = vtanh.f32 %v1290_v40  ;;  %v1308_v41 = vadd.f32 1.0, %v1594_v14 }
 0x8eb   :  { %1599 = vrcp.f32 %v1301_v13 }
 0x8ec   :  { %1601 = vrcp.f32 %v1308_v41 }
 0x8f6   :  { %v1596_v15 = vpop.eup %1595 }
 0x8f7   :  { %v1598_v0 = vpop.eup %1597 }
 0x8f8   :  { %v1600_v36 = vpop.eup %1599  ;;  %v1312_v43 = vmul.f32 %v1598_v0, %v1596_v15 }
 0x8f9   :  { %v1311_v44 = vmul.f32 %v1600_v36, %v1193_v16  ;;  %v1602_v6 = vpop.eup %1601 }
 0x8fb   :  { %v1313_v1 = vadd.f32 %v1312_v43, %v1311_v44 }
 0x8fd   :  { %1603 = vtanh.f32 %v1313_v1 }
 0x90a   :  { %v1604_v45 = vpop.eup %1603 }
 0x90b   :  { %v1315_v46 = vmul.f32 %v1604_v45, %v1602_v6 }
 0x90d   :  { %v1316_v35 = vpack.c.bf16 %v1315_v46, %v1315_v46 }
 0x90f   :  { %1318 = vst [vmem:[#allocation9 + $0x20] sm:$0xf] %v1316_v35 }
 0x910   :  { %1688 = shalt.err (!%p1685_p0)
}
 0x911   :  { %s1710_s22 = smov 64   ;;  %s1711_s23 = smov 4  }
 0x912   :  { %1332 = dma.vmem_to_hbm [thread:$0]  %s1327_s1, 576, %s2200_s2, [#allocation8], %s1710_s22, %s1710_s22, %s1711_s23  }
 0x913   :  { %1701 = dma.done.wait [#allocation8], 576  }
 0x914   :  { %1702 = vsyncadd [#allocation8], 4294966720 }
 0x915   :  { %1336 = vsyncpa [#allocation7], 1 }
 0x916   :  { %1337 = vsyncpa [#allocation8], 1 }
 0x917   :  { %1338 = vsyncmov [#allocation5] }
 0x91a   :  { %s1339_s26 = vpop.sfrf %1338 }
 0x91b   :  { %p1403_p1 = scmp.ne.s32.totalorder %s1339_s26, 0 }
 0x91d   :  { %1343 = shalt.err (%p1403_p1)  }

</bundles_post_ra>
